<compile_context>
chip_gen: v6e
topology: v6e:2x2x1
jax: 0.10.0
libtpu: 0.0.40
codegen_flags: <defaults>
</compile_context>

<pallas_src>
import functools
import math

import jax
import jax.numpy as jnp
from jax import lax
from jax.experimental import pallas as pl
from jax.experimental.pallas import tpu as pltpu

LN_EPS = 1e-5
NEG_INF = -1e30


# ----------------------------------------------------------------------------
# tiling / resource helpers
# ----------------------------------------------------------------------------
def _row_tile(rows, max_rows=1024):
    if rows <= max_rows:
        return rows                      # full dim -> always a legal block
    for r in range(max_rows, 0, -8):
        if rows % r == 0:
            return r
    return max_rows                      # non-dividing: pl.cdiv grid, masked edge tile


def _col_chunk(cols, max_cols=1024):
    if cols <= max_cols:
        return cols
    for c in range(max_cols - (max_cols % 128), 0, -128):
        if cols % c == 0:
            return c
    return cols                          # no aligned divisor: keep full width


def _head_groups(D, H, S, score_budget_bytes=8 << 20):
    """Number of head groups for the attention grid (Cg = D // groups)."""
    valid = [g for g in range(1, H + 1)
             if H % g == 0 and (D // g) % 128 == 0]
    for g in valid:                      # fewest groups whose f32 scores fit budget
        if (H // g) * S * S * 4 <= score_budget_bytes:
            return g
    return valid[-1] if valid else 1


def _vmem_limit_bytes():
    """Generation-aware VMEM limit: headroom on v7x, >default on v5e/v6e."""
    try:
        cap = int(pltpu.get_tpu_info().vmem_capacity_bytes)
    except Exception:
        cap = 64 << 20
    if cap >= (96 << 20):                # v4/v5e/v6e: 128 MiB physical
        return 100 << 20
    return max(cap - (12 << 20), (3 * cap) // 4)   # v7x: 64 MiB -> ~52 MiB


def _compiler_params(sem):
    return pltpu.CompilerParams(dimension_semantics=sem,
                                vmem_limit_bytes=_vmem_limit_bytes())


# ----------------------------------------------------------------------------
# Kernel 1: LayerNorm + linear (QKV projection), tiled rows x output columns
# ----------------------------------------------------------------------------
def _ln_linear_kernel(x_ref, lnw_ref, lnb_ref, w_ref, b_ref, o_ref, xn_s):
    @pl.when(pl.program_id(1) == 0)
    def _():
        xf = x_ref[...].astype(jnp.float32)
        mu = jnp.mean(xf, axis=-1, keepdims=True)
        var = jnp.mean(jnp.square(xf - mu), axis=-1, keepdims=True)
        xn = (xf - mu) * lax.rsqrt(var + LN_EPS)
        xn_s[...] = (xn * lnw_ref[...] + lnb_ref[...]).astype(xn_s.dtype)

    acc = jnp.dot(xn_s[...], w_ref[...], preferred_element_type=jnp.float32)
    o_ref[...] = (acc + b_ref[...]).astype(o_ref.dtype)


def _ln_linear(x2d, ln_w, ln_b, w, b, out_dtype=jnp.bfloat16):
    R, D = x2d.shape
    N = w.shape[1]
    Rt = _row_tile(R)
    Nc = _col_chunk(N)
    grid = (pl.cdiv(R, Rt), N // Nc)
    return pl.pallas_call(
        _ln_linear_kernel,
        out_shape=jax.ShapeDtypeStruct((R, N), out_dtype),
        grid=grid,
        in_specs=[
            pl.BlockSpec((Rt, D), lambda i, j: (i, 0)),
            pl.BlockSpec((1, D), lambda i, j: (0, 0)),
            pl.BlockSpec((1, D), lambda i, j: (0, 0)),
            pl.BlockSpec((D, Nc), lambda i, j: (0, j)),
            pl.BlockSpec((1, Nc), lambda i, j: (0, j)),
        ],
        out_specs=pl.BlockSpec((Rt, Nc), lambda i, j: (i, j)),
        scratch_shapes=[pltpu.VMEM((Rt, D), jnp.bfloat16)],
        compiler_params=_compiler_params(("parallel", "arbitrary")),
    )(x2d, ln_w, ln_b, w, b)


# ----------------------------------------------------------------------------
# Kernel 2: attention (per batch, per head-group) + out-projection + residual
# ----------------------------------------------------------------------------
def _attn_kernel(x_ref, q_ref, k_ref, v_ref, wo_ref, bo_ref, *rest,
                 scale, hg, dh, has_mask):
    if has_mask:
        mask_ref, o_ref, ctx_s = rest
    else:
        o_ref, ctx_s = rest

    @pl.when(pl.program_id(1) == 0)
    def _():
        # residual + out-proj bias written once per batch; head groups add on top
        o_ref[0] = x_ref[0].astype(jnp.float32) + bo_ref[...]

    # fold softmax scale into q: (S, Cg) multiplies instead of (S, S) per head
    qg = (q_ref[0].astype(jnp.float32) * scale).astype(q_ref.dtype)
    kg = k_ref[0]
    vg = v_ref[0]

    for h in range(hg):                       # static, small unroll (heads / group)
        lo = h * dh
        qh = qg[:, lo:lo + dh]
        kh = kg[:, lo:lo + dh]
        vh = vg[:, lo:lo + dh]
        s = lax.dot_general(qh, kh, (((1,), (1,)), ((), ())),
                            preferred_element_type=jnp.float32)      # (S, S)
        if has_mask:
            s = s + mask_ref[...]
        m = jnp.max(s, axis=-1, keepdims=True)
        p = jnp.exp(s - m)
        inv = pl.reciprocal(jnp.sum(p, axis=-1, keepdims=True), approx=True)
        p = (p * inv).astype(vh.dtype)
        ctx_s[:, lo:lo + dh] = jnp.dot(
            p, vh, preferred_element_type=jnp.float32).astype(ctx_s.dtype)

    # one full-depth (K = Cg) matmul for the whole head group's out-projection
    o_ref[0] += jnp.dot(ctx_s[...], wo_ref[...],
                        preferred_element_type=jnp.float32)


def _attention_cols(x_cols, qkv_cols, wo, bo, mask, *, S, B, D, H, scale, groups):
    """Fast path (D % 128 == 0): column-block views, no HBM relayouts."""
    has_mask = mask is not None
    dh = D // H
    hg = H // groups
    Cg = D // groups
    nq = 3 * groups                      # qkv column-blocks (width Cg) per batch

    in_specs = [
        pl.BlockSpec((1, S, D), lambda b, g: (0, 0, b)),                      # x
        pl.BlockSpec((1, S, Cg), lambda b, g: (0, 0, b * nq + g)),            # q
        pl.BlockSpec((1, S, Cg), lambda b, g: (0, 0, b * nq + groups + g)),   # k
        pl.BlockSpec((1, S, Cg), lambda b, g: (0, 0, b * nq + 2 * groups + g)),  # v
        pl.BlockSpec((Cg, D), lambda b, g: (g, 0)),                           # wo rows
        pl.BlockSpec((1, D), lambda b, g: (0, 0)),                            # bo
    ]
    inputs = [x_cols, qkv_cols, qkv_cols, qkv_cols, wo, bo]
    if has_mask:
        in_specs.append(pl.BlockSpec((S, S), lambda b, g: (0, 0)))
        inputs.append(mask)

    kernel = functools.partial(_attn_kernel, scale=scale, hg=hg, dh=dh,
                               has_mask=has_mask)
    return pl.pallas_call(
        kernel,
        out_shape=jax.ShapeDtypeStruct((1, S, B * D), jnp.float32),
        grid=(B, groups),
        in_specs=in_specs,
        out_specs=pl.BlockSpec((1, S, D), lambda b, g: (0, 0, b)),
        scratch_shapes=[pltpu.VMEM((S, Cg), jnp.bfloat16)],
        compiler_params=_compiler_params(("parallel", "arbitrary")),
    )(*inputs)


def _attention_rows(xb, qb, kb, vb, wo, bo, mask, *, S, B, D, H, scale):
    """Fallback for lane-unaligned d_model: batch-first arrays, one head group."""
    has_mask = mask is not None
    dh = D // H
    in_specs = [
        pl.BlockSpec((1, S, D), lambda b, g: (b, 0, 0)),
        pl.BlockSpec((1, S, D), lambda b, g: (b, 0, 0)),
        pl.BlockSpec((1, S, D), lambda b, g: (b, 0, 0)),
        pl.BlockSpec((1, S, D), lambda b, g: (b, 0, 0)),
        pl.BlockSpec((D, D), lambda b, g: (0, 0)),
        pl.BlockSpec((1, D), lambda b, g: (0, 0)),
    ]
    inputs = [xb, qb, kb, vb, wo, bo]
    if has_mask:
        in_specs.append(pl.BlockSpec((S, S), lambda b, g: (0, 0)))
        inputs.append(mask)

    kernel = functools.partial(_attn_kernel, scale=scale, hg=H, dh=dh,
                               has_mask=has_mask)
    return pl.pallas_call(
        kernel,
        out_shape=jax.ShapeDtypeStruct((B, S, D), jnp.float32),
        grid=(B, 1),
        in_specs=in_specs,
        out_specs=pl.BlockSpec((1, S, D), lambda b, g: (b, 0, 0)),
        scratch_shapes=[pltpu.VMEM((S, D), jnp.bfloat16)],
        compiler_params=_compiler_params(("parallel", "arbitrary")),
    )(*inputs)


# ----------------------------------------------------------------------------
# Kernel 3: LayerNorm + MLP(QuickGELU), 4D hidden dim streamed as a reduction
# ----------------------------------------------------------------------------
def _mlp_kernel(xres_ref, lnw_ref, lnb_ref, wfc_ref, bfc_ref, wpr_ref, bpr_ref,
                o_ref, xn_s, acc_s):
    j = pl.program_id(1)

    @pl.when(j == 0)
    def _():
        xf = xres_ref[...].astype(jnp.float32)
        mu = jnp.mean(xf, axis=-1, keepdims=True)
        var = jnp.mean(jnp.square(xf - mu), axis=-1, keepdims=True)
        xn = (xf - mu) * lax.rsqrt(var + LN_EPS)
        xn_s[...] = (xn * lnw_ref[...] + lnb_ref[...]).astype(xn_s.dtype)
        acc_s[...] = xf + bpr_ref[...]          # residual + c_proj bias (once)

    h = jnp.dot(xn_s[...], wfc_ref[...],
                preferred_element_type=jnp.float32) + bfc_ref[...]
    h = h * jax.nn.sigmoid(1.702 * h)           # QuickGELU (f32)
    acc_s[...] += jnp.dot(h.astype(wpr_ref.dtype), wpr_ref[...],
                          preferred_element_type=jnp.float32)

    @pl.when(j == pl.num_programs(1) - 1)
    def _():
        o_ref[...] = acc_s[...].astype(o_ref.dtype)


def _mlp(xres2d, ln_w, ln_b, wfc, bfc, wpr, bpr, out_dtype):
    R, D = xres2d.shape
    Hd = wfc.shape[1]
    Rt = _row_tile(R)
    Hc = _col_chunk(Hd)
    grid = (pl.cdiv(R, Rt), Hd // Hc)
    return pl.pallas_call(
        _mlp_kernel,
        out_shape=jax.ShapeDtypeStruct((R, D), out_dtype),
        grid=grid,
        in_specs=[
            pl.BlockSpec((Rt, D), lambda i, j: (i, 0)),
            pl.BlockSpec((1, D), lambda i, j: (0, 0)),
            pl.BlockSpec((1, D), lambda i, j: (0, 0)),
            pl.BlockSpec((D, Hc), lambda i, j: (0, j)),
            pl.BlockSpec((1, Hc), lambda i, j: (0, j)),
            pl.BlockSpec((Hc, D), lambda i, j: (j, 0)),
            pl.BlockSpec((1, D), lambda i, j: (0, 0)),
        ],
        out_specs=pl.BlockSpec((Rt, D), lambda i, j: (i, 0)),
        scratch_shapes=[pltpu.VMEM((Rt, D), jnp.bfloat16),
                        pltpu.VMEM((Rt, D), jnp.float32)],
        compiler_params=_compiler_params(("parallel", "arbitrary")),
    )(xres2d, ln_w, ln_b, wfc, bfc, wpr, bpr)


# ----------------------------------------------------------------------------
# Full ResidualAttentionBlock forward
# ----------------------------------------------------------------------------
def residual_attention_block(x, params, attn_mask=None, *, num_heads):
    """x: (S, B, D) seq-first, like the PyTorch module."""
    S, B, D = x.shape
    H = int(num_heads)
    assert D % H == 0
    dh = D // H
    scale = 1.0 / math.sqrt(dh)
    R = S * B

    x2d = x.reshape(R, D)                                  # free view
    qkv = _ln_linear(x2d, params['ln1_w'], params['ln1_b'],
                     params['wqkv'], params['bqkv'])       # (R, 3D) bf16
    mask = None if attn_mask is None else attn_mask.astype(jnp.float32)

    if D % 128 == 0:
        groups = _head_groups(D, H, S)
        x_cols = x.reshape(1, S, B * D)                    # free views
        qkv_cols = qkv.reshape(1, S, B * 3 * D)
        attn = _attention_cols(x_cols, qkv_cols, params['wo'], params['bo'],
                               mask, S=S, B=B, D=D, H=H, scale=scale,
                               groups=groups)
        x_res2d = attn.reshape(R, D)
    else:
        # Fallback for lane-unaligned d_model: one batch-first relayout.
        xb = jnp.transpose(x, (1, 0, 2))
        qkvb = jnp.transpose(qkv.reshape(S, B, 3 * D), (1, 0, 2))
        qb, kb, vb = qkvb[..., :D], qkvb[..., D:2 * D], qkvb[..., 2 * D:]
        attn = _attention_rows(xb, qb, kb, vb, params['wo'], params['bo'],
                               mask, S=S, B=B, D=D, H=H, scale=scale)
        x_res2d = jnp.transpose(attn, (1, 0, 2)).reshape(R, D)

    out2d = _mlp(x_res2d, params['ln2_w'], params['ln2_b'],
                 params['wfc'], params['bfc'], params['wpr'], params['bpr'],
                 out_dtype=x.dtype)
    return out2d.reshape(S, B, D)


# ----------------------------------------------------------------------------
# Parameters (PyTorch-equivalent shapes; matmul weights stored bf16 and
# pre-transposed to (in, out); wo is W_o^T, i.e. (D, D) with head-major rows)
# ----------------------------------------------------------------------------
def init_block_params(key, d_model, n_head):
    assert d_model % n_head == 0
    ks = jax.random.split(key, 12)
    std = d_model ** -0.5
    nrm = lambda k, shape, s: jax.random.normal(k, shape, jnp.float32) * s
    return dict(
        ln1_w=1.0 + nrm(ks[0], (1, d_model), 0.02),
        ln1_b=nrm(ks[1], (1, d_model), 0.02),
        wqkv=nrm(ks[2], (d_model, 3 * d_model), std).astype(jnp.bfloat16),
        bqkv=nrm(ks[3], (1, 3 * d_model), 0.02),
        wo=nrm(ks[4], (d_model, d_model), std).astype(jnp.bfloat16),
        bo=nrm(ks[5], (1, d_model), 0.02),
        ln2_w=1.0 + nrm(ks[6], (1, d_model), 0.02),
        ln2_b=nrm(ks[7], (1, d_model), 0.02),
        wfc=nrm(ks[8], (d_model, 4 * d_model), std).astype(jnp.bfloat16),
        bfc=nrm(ks[9], (1, 4 * d_model), 0.02),
        wpr=nrm(ks[10], (4 * d_model, d_model),
                (4 * d_model) ** -0.5).astype(jnp.bfloat16),
        bpr=nrm(ks[11], (1, d_model), 0.02),
    )


# ----------------------------------------------------------------------------
# Pure-JAX reference (f32) of the PyTorch block, for a tolerance check
# ----------------------------------------------------------------------------
def resblock_reference(x, params, attn_mask=None, *, num_heads):
    S, B, D = x.shape
    H = int(num_heads)
    dh = D // H
    f32 = jnp.float32

    def ln(v, w, b):
        mu = jnp.mean(v, -1, keepdims=True)
        var = jnp.mean(jnp.square(v - mu), -1, keepdims=True)
        return (v - mu) * lax.rsqrt(var + LN_EPS) * w + b

    xf = x.astype(f32)
    xn = ln(xf, params['ln1_w'][0], params['ln1_b'][0])
    qkv = xn @ params['wqkv'].astype(f32) + params['bqkv'][0]
    q, k, v = jnp.split(qkv, 3, axis=-1)
    q = q.reshape(S, B, H, dh) * (dh ** -0.5)
    k = k.reshape(S, B, H, dh)
    v = v.reshape(S, B, H, dh)
    s = jnp.einsum('qbhd,kbhd->bhqk', q, k)
    if attn_mask is not None:
        s = s + attn_mask.astype(f32)
    p = jax.nn.softmax(s, axis=-1)
    ctx = jnp.einsum('bhqk,kbhd->qbhd', p, v).reshape(S, B, D)
    attn_out = ctx @ params['wo'].astype(f32) + params['bo'][0]
    xf = xf + attn_out
    xn2 = ln(xf, params['ln2_w'][0], params['ln2_b'][0])
    h = xn2 @ params['wfc'].astype(f32) + params['bfc'][0]
    h = h * jax.nn.sigmoid(1.702 * h)
    out = xf + h @ params['wpr'].astype(f32) + params['bpr'][0]
    return out.astype(x.dtype)


# ----------------------------------------------------------------------------
if __name__ == "__main__":
    d_model, n_head, seq_len, batch = 128, 2, 8, 2

    key = jax.random.PRNGKey(0)
    kp, kx = jax.random.split(key)
    params = init_block_params(kp, d_model, n_head)
    x = jax.random.normal(kx, (seq_len, batch, d_model), jnp.float32)
    causal_mask = jnp.triu(
        jnp.full((seq_len, seq_len), NEG_INF, jnp.float32), k=1)

    fwd = jax.jit(residual_attention_block, static_argnames=("num_heads",))

    out_plain = fwd(x, params, None, num_heads=n_head)
    out_causal = fwd(x, params, causal_mask, num_heads=n_head)
    jax.block_until_ready((out_plain, out_causal))

    ref_plain = resblock_reference(x, params, None, num_heads=n_head)
    ref_causal = resblock_reference(x, params, causal_mask, num_heads=n_head)

    assert out_plain.shape == (seq_len, batch, d_model)
    assert out_causal.shape == (seq_len, batch, d_model)
    for got, ref in ((out_plain, ref_plain), (out_causal, ref_causal)):
        assert bool(jnp.all(jnp.isfinite(got)))
        err = float(jnp.max(jnp.abs(got - ref)))
        assert err < 1e-1, f"max abs error {err}"

    print("KERNEL_OK")
</pallas_src>

<mosaic_0001>
module attributes {stable_mosaic.version = 11 : i64} {
  func.func @_ln_linear_kernel(%arg0: i32, %arg1: i32, %arg2: memref<16x128xf32, #tpu.memory_space<vmem>>, %arg3: memref<1x128xf32, #tpu.memory_space<vmem>>, %arg4: memref<1x128xf32, #tpu.memory_space<vmem>>, %arg5: memref<128x384xbf16, #tpu.memory_space<vmem>>, %arg6: memref<1x384xf32, #tpu.memory_space<vmem>>, %arg7: memref<16x384xbf16, #tpu.memory_space<vmem>>, %arg8: memref<16x128xbf16, #tpu.memory_space<vmem>>) attributes {dimension_semantics = [#tpu.dimension_semantics<parallel>, #tpu.dimension_semantics<arbitrary>], iteration_bounds = array<i64: 1, 1>, scalar_prefetch = 0 : i64, scratch_operands = 1 : i64, tpu.core_type = #tpu.core_type<tc>, window_params = [{transform_indices = @transform_0, window_bounds = array<i64: 16, 128>}, {pipeline_mode = #tpu.pipeline_mode<synchronous>, transform_indices = @transform_1, window_bounds = array<i64: 1, 128>}, {pipeline_mode = #tpu.pipeline_mode<synchronous>, transform_indices = @transform_2, window_bounds = array<i64: 1, 128>}, {transform_indices = @transform_3, window_bounds = array<i64: 128, 384>}, {transform_indices = @transform_4, window_bounds = array<i64: 1, 384>}, {transform_indices = @transform_5, window_bounds = array<i64: 16, 384>}]} {
    %c0_i32 = arith.constant 0 : i32
    %0 = arith.cmpi eq, %arg1, %c0_i32 : i32
    %1 = arith.extui %0 : i1 to i32
    %c0_i32_0 = arith.constant 0 : i32
    %2 = arith.cmpi ne, %1, %c0_i32_0 : i32
    scf.if %2 {
      %c0_8 = arith.constant 0 : index
      %c0_9 = arith.constant 0 : index
      %11 = vector.load %arg2[%c0_8, %c0_9] : memref<16x128xf32, #tpu.memory_space<vmem>>, vector<16x128xf32>
      %cst_10 = arith.constant dense<0.000000e+00> : vector<16xf32>
      %12 = vector.multi_reduction <add>, %11, %cst_10 [1] : vector<16x128xf32> to vector<16xf32>
      %13 = vector.shape_cast %12 : vector<16xf32> to vector<16x1xf32>
      %cst_11 = arith.constant 1.280000e+02 : f32
      %14 = vector.broadcast %cst_11 : f32 to vector<16x1xf32>
      %15 = arith.divf %13, %14 : vector<16x1xf32>
      %16 = vector.broadcast %15 : vector<16x1xf32> to vector<16x128xf32>
      %17 = arith.subf %11, %16 : vector<16x128xf32>
      %18 = arith.mulf %17, %17 : vector<16x128xf32>
      %cst_12 = arith.constant dense<0.000000e+00> : vector<16xf32>
      %19 = vector.multi_reduction <add>, %18, %cst_12 [1] : vector<16x128xf32> to vector<16xf32>
      %20 = vector.shape_cast %19 : vector<16xf32> to vector<16x1xf32>
      %cst_13 = arith.constant 1.280000e+02 : f32
      %21 = vector.broadcast %cst_13 : f32 to vector<16x1xf32>
      %22 = arith.divf %20, %21 : vector<16x1xf32>
      %23 = vector.broadcast %15 : vector<16x1xf32> to vector<16x128xf32>
      %24 = arith.subf %11, %23 : vector<16x128xf32>
      %cst_14 = arith.constant 9.99999974E-6 : f32
      %25 = vector.broadcast %cst_14 : f32 to vector<16x1xf32>
      %26 = arith.addf %22, %25 : vector<16x1xf32>
      %27 = math.rsqrt %26 : vector<16x1xf32>
      %28 = vector.broadcast %27 : vector<16x1xf32> to vector<16x128xf32>
      %29 = arith.mulf %24, %28 : vector<16x128xf32>
      %c0_15 = arith.constant 0 : index
      %c0_16 = arith.constant 0 : index
      %30 = vector.load %arg3[%c0_15, %c0_16] : memref<1x128xf32, #tpu.memory_space<vmem>>, vector<1x128xf32>
      %31 = vector.broadcast %30 : vector<1x128xf32> to vector<16x128xf32>
      %32 = arith.mulf %29, %31 : vector<16x128xf32>
      %c0_17 = arith.constant 0 : index
      %c0_18 = arith.constant 0 : index
      %33 = vector.load %arg4[%c0_17, %c0_18] : memref<1x128xf32, #tpu.memory_space<vmem>>, vector<1x128xf32>
      %34 = vector.broadcast %33 : vector<1x128xf32> to vector<16x128xf32>
      %35 = arith.addf %32, %34 : vector<16x128xf32>
      %36 = arith.truncf %35 : vector<16x128xf32> to vector<16x128xbf16>
      %c0_19 = arith.constant 0 : index
      %c0_20 = arith.constant 0 : index
      %37 = vector.load %arg8[%c0_19, %c0_20] : memref<16x128xbf16, #tpu.memory_space<vmem>>, vector<16x128xbf16>
      tpu.vector_store %arg8[%c0_19, %c0_20], %36 {strides = array<i32>} : memref<16x128xbf16, #tpu.memory_space<vmem>>, vector<16x128xbf16>,
    } else {
    }
    %c0 = arith.constant 0 : index
    %c0_1 = arith.constant 0 : index
    %3 = vector.load %arg8[%c0, %c0_1] : memref<16x128xbf16, #tpu.memory_space<vmem>>, vector<16x128xbf16>
    %c0_2 = arith.constant 0 : index
    %c0_3 = arith.constant 0 : index
    %4 = vector.load %arg5[%c0_2, %c0_3] : memref<128x384xbf16, #tpu.memory_space<vmem>>, vector<128x384xbf16>
    %cst = arith.constant dense<0.000000e+00> : vector<16x384xf32>
    %5 = tpu.matmul %3, %4, %cst {dimension_numbers = #tpu.dot_dimension_numbers<[1], [0], [0], [1], [0, 0, 1, 1], [], []>} : vector<16x128xbf16>, vector<128x384xbf16>, vector<16x384xf32> -> vector<16x384xf32>
    %c0_4 = arith.constant 0 : index
    %c0_5 = arith.constant 0 : index
    %6 = vector.load %arg6[%c0_4, %c0_5] : memref<1x384xf32, #tpu.memory_space<vmem>>, vector<1x384xf32>
    %7 = vector.broadcast %6 : vector<1x384xf32> to vector<16x384xf32>
    %8 = arith.addf %5, %7 : vector<16x384xf32>
    %9 = arith.truncf %8 : vector<16x384xf32> to vector<16x384xbf16>
    %c0_6 = arith.constant 0 : index
    %c0_7 = arith.constant 0 : index
    %10 = vector.load %arg7[%c0_6, %c0_7] : memref<16x384xbf16, #tpu.memory_space<vmem>>, vector<16x384xbf16>
    tpu.vector_store %arg7[%c0_6, %c0_7], %9 {strides = array<i32>} : memref<16x384xbf16, #tpu.memory_space<vmem>>, vector<16x384xbf16>,
    return
  }
  func.func @transform_0(%arg0: i32, %arg1: i32) -> (i32, i32) {
    %c0_i32 = arith.constant 0 : i32
    %c0_i32_0 = arith.constant 0 : i32
    return %arg0, %c0_i32 : i32, i32
  }
  func.func @transform_1(%arg0: i32, %arg1: i32) -> (i32, i32) {
    %c0_i32 = arith.constant 0 : i32
    %c0_i32_0 = arith.constant 0 : i32
    %c0_i32_1 = arith.constant 0 : i32
    return %c0_i32, %c0_i32_0 : i32, i32
  }
  func.func @transform_2(%arg0: i32, %arg1: i32) -> (i32, i32) {
    %c0_i32 = arith.constant 0 : i32
    %c0_i32_0 = arith.constant 0 : i32
    %c0_i32_1 = arith.constant 0 : i32
    return %c0_i32, %c0_i32_0 : i32, i32
  }
  func.func @transform_3(%arg0: i32, %arg1: i32) -> (i32, i32) {
    %c0_i32 = arith.constant 0 : i32
    %c0_i32_0 = arith.constant 0 : i32
    return %c0_i32, %arg1 : i32, i32
  }
  func.func @transform_4(%arg0: i32, %arg1: i32) -> (i32, i32) {
    %c0_i32 = arith.constant 0 : i32
    %c0_i32_0 = arith.constant 0 : i32
    return %c0_i32, %arg1 : i32, i32
  }
  func.func @transform_5(%arg0: i32, %arg1: i32) -> (i32, i32) {
    %c0_i32 = arith.constant 0 : i32
    return %arg0, %arg1 : i32, i32
  }
}

module attributes {stable_mosaic.version = 11 : i64} {
  func.func @_attn_kernel(%arg0: i32, %arg1: i32, %arg2: memref<1x8x128xf32, #tpu.memory_space<vmem>>, %arg3: memref<1x8x128xbf16, #tpu.memory_space<vmem>>, %arg4: memref<1x8x128xbf16, #tpu.memory_space<vmem>>, %arg5: memref<1x8x128xbf16, #tpu.memory_space<vmem>>, %arg6: memref<128x128xbf16, #tpu.memory_space<vmem>>, %arg7: memref<1x128xf32, #tpu.memory_space<vmem>>, %arg8: memref<1x8x128xf32, #tpu.memory_space<vmem>>, %arg9: memref<8x128xbf16, #tpu.memory_space<vmem>>) attributes {dimension_semantics = [#tpu.dimension_semantics<parallel>, #tpu.dimension_semantics<arbitrary>], iteration_bounds = array<i64: 2, 1>, scalar_prefetch = 0 : i64, scratch_operands = 1 : i64, tpu.core_type = #tpu.core_type<tc>, window_params = [{transform_indices = @transform_0, window_bounds = array<i64: 1, 8, 128>}, {transform_indices = @transform_1, window_bounds = array<i64: 1, 8, 128>}, {transform_indices = @transform_2, window_bounds = array<i64: 1, 8, 128>}, {transform_indices = @transform_3, window_bounds = array<i64: 1, 8, 128>}, {transform_indices = @transform_4, window_bounds = array<i64: 128, 128>}, {pipeline_mode = #tpu.pipeline_mode<synchronous>, transform_indices = @transform_5, window_bounds = array<i64: 1, 128>}, {transform_indices = @transform_6, window_bounds = array<i64: 1, 8, 128>}]} {
    %c0_i32 = arith.constant 0 : i32
    %0 = arith.cmpi eq, %arg1, %c0_i32 : i32
    %1 = arith.extui %0 : i1 to i32
    %c0_i32_0 = arith.constant 0 : i32
    %2 = arith.cmpi ne, %1, %c0_i32_0 : i32
    scf.if %2 {
      %c0_31 = arith.constant 0 : index
      %c0_32 = arith.constant 0 : index
      %c0_33 = arith.constant 0 : index
      %58 = vector.load %arg2[%c0_31, %c0_32, %c0_33] : memref<1x8x128xf32, #tpu.memory_space<vmem>>, vector<1x8x128xf32>
      %59 = vector.shape_cast %58 : vector<1x8x128xf32> to vector<8x128xf32>
      %c0_34 = arith.constant 0 : index
      %c0_35 = arith.constant 0 : index
      %60 = vector.load %arg7[%c0_34, %c0_35] : memref<1x128xf32, #tpu.memory_space<vmem>>, vector<1x128xf32>
      %61 = vector.broadcast %60 : vector<1x128xf32> to vector<8x128xf32>
      %62 = arith.addf %59, %61 : vector<8x128xf32>
      %c0_36 = arith.constant 0 : index
      %c0_37 = arith.constant 0 : index
      %c0_38 = arith.constant 0 : index
      %63 = vector.load %arg8[%c0_36, %c0_37, %c0_38] : memref<1x8x128xf32, #tpu.memory_space<vmem>>, vector<1x8x128xf32>
      %64 = vector.shape_cast %63 : vector<1x8x128xf32> to vector<8x128xf32>
      %65 = vector.shape_cast %62 : vector<8x128xf32> to vector<1x8x128xf32>
      tpu.vector_store %arg8[%c0_36, %c0_37, %c0_38], %65 {strides = array<i32>} : memref<1x8x128xf32, #tpu.memory_space<vmem>>, vector<1x8x128xf32>,
    } else {
    }
    %c0 = arith.constant 0 : index
    %c0_1 = arith.constant 0 : index
    %c0_2 = arith.constant 0 : index
    %3 = vector.load %arg3[%c0, %c0_1, %c0_2] : memref<1x8x128xbf16, #tpu.memory_space<vmem>>, vector<1x8x128xbf16>
    %4 = vector.shape_cast %3 : vector<1x8x128xbf16> to vector<8x128xbf16>
    %5 = arith.extf %4 : vector<8x128xbf16> to vector<8x128xf32>
    %cst = arith.constant 1.250000e-01 : f32
    %6 = vector.broadcast %cst : f32 to vector<8x128xf32>
    %7 = arith.mulf %5, %6 : vector<8x128xf32>
    %8 = arith.truncf %7 : vector<8x128xf32> to vector<8x128xbf16>
    %c0_3 = arith.constant 0 : index
    %c0_4 = arith.constant 0 : index
    %c0_5 = arith.constant 0 : index
    %9 = vector.load %arg4[%c0_3, %c0_4, %c0_5] : memref<1x8x128xbf16, #tpu.memory_space<vmem>>, vector<1x8x128xbf16>
    %10 = vector.shape_cast %9 : vector<1x8x128xbf16> to vector<8x128xbf16>
    %c0_6 = arith.constant 0 : index
    %c0_7 = arith.constant 0 : index
    %c0_8 = arith.constant 0 : index
    %11 = vector.load %arg5[%c0_6, %c0_7, %c0_8] : memref<1x8x128xbf16, #tpu.memory_space<vmem>>, vector<1x8x128xbf16>
    %12 = vector.shape_cast %11 : vector<1x8x128xbf16> to vector<8x128xbf16>
    %13 = vector.extract_strided_slice %8 {offsets = [0, 0], sizes = [8, 64], strides = [1, 1]} : vector<8x128xbf16> to vector<8x64xbf16>
    %14 = vector.extract_strided_slice %10 {offsets = [0, 0], sizes = [8, 64], strides = [1, 1]} : vector<8x128xbf16> to vector<8x64xbf16>
    %15 = vector.extract_strided_slice %12 {offsets = [0, 0], sizes = [8, 64], strides = [1, 1]} : vector<8x128xbf16> to vector<8x64xbf16>
    %cst_9 = arith.constant dense<0.000000e+00> : vector<8x8xf32>
    %16 = tpu.matmul %13, %14, %cst_9 {dimension_numbers = #tpu.dot_dimension_numbers<[1], [1], [0], [0], [0, 0, 1, 0], [], []>} : vector<8x64xbf16>, vector<8x64xbf16>, vector<8x8xf32> -> vector<8x8xf32>
    %cst_10 = arith.constant dense<0xFF800000> : vector<8xf32>
    %17 = vector.multi_reduction <maximumf>, %16, %cst_10 [1] : vector<8x8xf32> to vector<8xf32>
    %18 = vector.shape_cast %17 : vector<8xf32> to vector<8x1xf32>
    %19 = vector.broadcast %18 : vector<8x1xf32> to vector<8x8xf32>
    %20 = arith.subf %16, %19 : vector<8x8xf32>
    %21 = math.exp %20 : vector<8x8xf32>
    %cst_11 = arith.constant dense<0.000000e+00> : vector<8xf32>
    %22 = vector.multi_reduction <add>, %21, %cst_11 [1] : vector<8x8xf32> to vector<8xf32>
    %23 = vector.shape_cast %22 : vector<8xf32> to vector<8x1xf32>
    %24 = tpu.reciprocal %23 {approx = true} : vector<8x1xf32> -> vector<8x1xf32>
    %25 = vector.broadcast %24 : vector<8x1xf32> to vector<8x8xf32>
    %26 = arith.mulf %21, %25 : vector<8x8xf32>
    %27 = arith.truncf %26 : vector<8x8xf32> to vector<8x8xbf16>
    %cst_12 = arith.constant dense<0.000000e+00> : vector<8x64xf32>
    %28 = tpu.matmul %27, %15, %cst_12 {dimension_numbers = #tpu.dot_dimension_numbers<[1], [0], [0], [1], [0, 0, 1, 1], [], []>} : vector<8x8xbf16>, vector<8x64xbf16>, vector<8x64xf32> -> vector<8x64xf32>
    %29 = arith.truncf %28 : vector<8x64xf32> to vector<8x64xbf16>
    %c0_13 = arith.constant 0 : index
    %c0_14 = arith.constant 0 : index
    %30 = vector.load %arg9[%c0_13, %c0_14] : memref<8x128xbf16, #tpu.memory_space<vmem>>, vector<8x64xbf16>
    tpu.vector_store %arg9[%c0_13, %c0_14], %29 {strides = array<i32>} : memref<8x128xbf16, #tpu.memory_space<vmem>>, vector<8x64xbf16>,
    %31 = vector.extract_strided_slice %8 {offsets = [0, 64], sizes = [8, 64], strides = [1, 1]} : vector<8x128xbf16> to vector<8x64xbf16>
    %32 = vector.extract_strided_slice %10 {offsets = [0, 64], sizes = [8, 64], strides = [1, 1]} : vector<8x128xbf16> to vector<8x64xbf16>
    %33 = vector.extract_strided_slice %12 {offsets = [0, 64], sizes = [8, 64], strides = [1, 1]} : vector<8x128xbf16> to vector<8x64xbf16>
    %cst_15 = arith.constant dense<0.000000e+00> : vector<8x8xf32>
    %34 = tpu.matmul %31, %32, %cst_15 {dimension_numbers = #tpu.dot_dimension_numbers<[1], [1], [0], [0], [0, 0, 1, 0], [], []>} : vector<8x64xbf16>, vector<8x64xbf16>, vector<8x8xf32> -> vector<8x8xf32>
    %cst_16 = arith.constant dense<0xFF800000> : vector<8xf32>
    %35 = vector.multi_reduction <maximumf>, %34, %cst_16 [1] : vector<8x8xf32> to vector<8xf32>
    %36 = vector.shape_cast %35 : vector<8xf32> to vector<8x1xf32>
    %37 = vector.broadcast %36 : vector<8x1xf32> to vector<8x8xf32>
    %38 = arith.subf %34, %37 : vector<8x8xf32>
    %39 = math.exp %38 : vector<8x8xf32>
    %cst_17 = arith.constant dense<0.000000e+00> : vector<8xf32>
    %40 = vector.multi_reduction <add>, %39, %cst_17 [1] : vector<8x8xf32> to vector<8xf32>
    %41 = vector.shape_cast %40 : vector<8xf32> to vector<8x1xf32>
    %42 = tpu.reciprocal %41 {approx = true} : vector<8x1xf32> -> vector<8x1xf32>
    %43 = vector.broadcast %42 : vector<8x1xf32> to vector<8x8xf32>
    %44 = arith.mulf %39, %43 : vector<8x8xf32>
    %45 = arith.truncf %44 : vector<8x8xf32> to vector<8x8xbf16>
    %cst_18 = arith.constant dense<0.000000e+00> : vector<8x64xf32>
    %46 = tpu.matmul %45, %33, %cst_18 {dimension_numbers = #tpu.dot_dimension_numbers<[1], [0], [0], [1], [0, 0, 1, 1], [], []>} : vector<8x8xbf16>, vector<8x64xbf16>, vector<8x64xf32> -> vector<8x64xf32>
    %47 = arith.truncf %46 : vector<8x64xf32> to vector<8x64xbf16>
    %c0_19 = arith.constant 0 : index
    %c64 = arith.constant 64 : index
    %48 = vector.load %arg9[%c0_19, %c64] : memref<8x128xbf16, #tpu.memory_space<vmem>>, vector<8x64xbf16>
    tpu.vector_store %arg9[%c0_19, %c64], %47 {strides = array<i32>} : memref<8x128xbf16, #tpu.memory_space<vmem>>, vector<8x64xbf16>,
    %c0_20 = arith.constant 0 : index
    %c0_21 = arith.constant 0 : index
    %c0_22 = arith.constant 0 : index
    %49 = vector.load %arg8[%c0_20, %c0_21, %c0_22] : memref<1x8x128xf32, #tpu.memory_space<vmem>>, vector<1x8x128xf32>
    %50 = vector.shape_cast %49 : vector<1x8x128xf32> to vector<8x128xf32>
    %c0_23 = arith.constant 0 : index
    %c0_24 = arith.constant 0 : index
    %51 = vector.load %arg9[%c0_23, %c0_24] : memref<8x128xbf16, #tpu.memory_space<vmem>>, vector<8x128xbf16>
    %c0_25 = arith.constant 0 : index
    %c0_26 = arith.constant 0 : index
    %52 = vector.load %arg6[%c0_25, %c0_26] : memref<128x128xbf16, #tpu.memory_space<vmem>>, vector<128x128xbf16>
    %cst_27 = arith.constant dense<0.000000e+00> : vector<8x128xf32>
    %53 = tpu.matmul %51, %52, %cst_27 {dimension_numbers = #tpu.dot_dimension_numbers<[1], [0], [0], [1], [0, 0, 1, 1], [], []>} : vector<8x128xbf16>, vector<128x128xbf16>, vector<8x128xf32> -> vector<8x128xf32>
    %54 = arith.addf %50, %53 : vector<8x128xf32>
    %c0_28 = arith.constant 0 : index
    %c0_29 = arith.constant 0 : index
    %c0_30 = arith.constant 0 : index
    %55 = vector.load %arg8[%c0_28, %c0_29, %c0_30] : memref<1x8x128xf32, #tpu.memory_space<vmem>>, vector<1x8x128xf32>
    %56 = vector.shape_cast %55 : vector<1x8x128xf32> to vector<8x128xf32>
    %57 = vector.shape_cast %54 : vector<8x128xf32> to vector<1x8x128xf32>
    tpu.vector_store %arg8[%c0_28, %c0_29, %c0_30], %57 {strides = array<i32>} : memref<1x8x128xf32, #tpu.memory_space<vmem>>, vector<1x8x128xf32>,
    return
  }
  func.func @transform_0(%arg0: i32, %arg1: i32) -> (i32, i32, i32) {
    %c0_i32 = arith.constant 0 : i32
    %c0_i32_0 = arith.constant 0 : i32
    %c0_i32_1 = arith.constant 0 : i32
    return %c0_i32, %c0_i32_0, %arg0 : i32, i32, i32
  }
  func.func @transform_1(%arg0: i32, %arg1: i32) -> (i32, i32, i32) {
    %c3_i32 = arith.constant 3 : i32
    %0 = arith.muli %arg0, %c3_i32 : i32
    %1 = arith.addi %0, %arg1 : i32
    %c0_i32 = arith.constant 0 : i32
    %c0_i32_0 = arith.constant 0 : i32
    %c0_i32_1 = arith.constant 0 : i32
    return %c0_i32, %c0_i32_0, %1 : i32, i32, i32
  }
  func.func @transform_2(%arg0: i32, %arg1: i32) -> (i32, i32, i32) {
    %c3_i32 = arith.constant 3 : i32
    %0 = arith.muli %arg0, %c3_i32 : i32
    %c1_i32 = arith.constant 1 : i32
    %1 = arith.addi %0, %c1_i32 : i32
    %2 = arith.addi %1, %arg1 : i32
    %c0_i32 = arith.constant 0 : i32
    %c0_i32_0 = arith.constant 0 : i32
    %c0_i32_1 = arith.constant 0 : i32
    return %c0_i32, %c0_i32_0, %2 : i32, i32, i32
  }
  func.func @transform_3(%arg0: i32, %arg1: i32) -> (i32, i32, i32) {
    %c3_i32 = arith.constant 3 : i32
    %0 = arith.muli %arg0, %c3_i32 : i32
    %c2_i32 = arith.constant 2 : i32
    %1 = arith.addi %0, %c2_i32 : i32
    %2 = arith.addi %1, %arg1 : i32
    %c0_i32 = arith.constant 0 : i32
    %c0_i32_0 = arith.constant 0 : i32
    %c0_i32_1 = arith.constant 0 : i32
    return %c0_i32, %c0_i32_0, %2 : i32, i32, i32
  }
  func.func @transform_4(%arg0: i32, %arg1: i32) -> (i32, i32) {
    %c0_i32 = arith.constant 0 : i32
    %c0_i32_0 = arith.constant 0 : i32
    return %arg1, %c0_i32 : i32, i32
  }
  func.func @transform_5(%arg0: i32, %arg1: i32) -> (i32, i32) {
    %c0_i32 = arith.constant 0 : i32
    %c0_i32_0 = arith.constant 0 : i32
    %c0_i32_1 = arith.constant 0 : i32
    return %c0_i32, %c0_i32_0 : i32, i32
  }
  func.func @transform_6(%arg0: i32, %arg1: i32) -> (i32, i32, i32) {
    %c0_i32 = arith.constant 0 : i32
    %c0_i32_0 = arith.constant 0 : i32
    %c0_i32_1 = arith.constant 0 : i32
    return %c0_i32, %c0_i32_0, %arg0 : i32, i32, i32
  }
}

module attributes {stable_mosaic.version = 11 : i64} {
  func.func @_mlp_kernel(%arg0: i32, %arg1: i32, %arg2: memref<16x128xf32, #tpu.memory_space<vmem>>, %arg3: memref<1x128xf32, #tpu.memory_space<vmem>>, %arg4: memref<1x128xf32, #tpu.memory_space<vmem>>, %arg5: memref<128x512xbf16, #tpu.memory_space<vmem>>, %arg6: memref<1x512xf32, #tpu.memory_space<vmem>>, %arg7: memref<512x128xbf16, #tpu.memory_space<vmem>>, %arg8: memref<1x128xf32, #tpu.memory_space<vmem>>, %arg9: memref<16x128xf32, #tpu.memory_space<vmem>>, %arg10: memref<16x128xbf16, #tpu.memory_space<vmem>>, %arg11: memref<16x128xf32, #tpu.memory_space<vmem>>) attributes {dimension_semantics = [#tpu.dimension_semantics<parallel>, #tpu.dimension_semantics<arbitrary>], iteration_bounds = array<i64: 1, 1>, scalar_prefetch = 0 : i64, scratch_operands = 2 : i64, tpu.core_type = #tpu.core_type<tc>, window_params = [{transform_indices = @transform_0, window_bounds = array<i64: 16, 128>}, {pipeline_mode = #tpu.pipeline_mode<synchronous>, transform_indices = @transform_1, window_bounds = array<i64: 1, 128>}, {pipeline_mode = #tpu.pipeline_mode<synchronous>, transform_indices = @transform_2, window_bounds = array<i64: 1, 128>}, {transform_indices = @transform_3, window_bounds = array<i64: 128, 512>}, {transform_indices = @transform_4, window_bounds = array<i64: 1, 512>}, {transform_indices = @transform_5, window_bounds = array<i64: 512, 128>}, {pipeline_mode = #tpu.pipeline_mode<synchronous>, transform_indices = @transform_6, window_bounds = array<i64: 1, 128>}, {transform_indices = @transform_7, window_bounds = array<i64: 16, 128>}]} {
    %c0_i32 = arith.constant 0 : i32
    %0 = arith.cmpi eq, %arg1, %c0_i32 : i32
    %1 = arith.extui %0 : i1 to i32
    %c0_i32_0 = arith.constant 0 : i32
    %2 = arith.cmpi ne, %1, %c0_i32_0 : i32
    scf.if %2 {
      %c0_17 = arith.constant 0 : index
      %c0_18 = arith.constant 0 : index
      %26 = vector.load %arg2[%c0_17, %c0_18] : memref<16x128xf32, #tpu.memory_space<vmem>>, vector<16x128xf32>
      %cst_19 = arith.constant dense<0.000000e+00> : vector<16xf32>
      %27 = vector.multi_reduction <add>, %26, %cst_19 [1] : vector<16x128xf32> to vector<16xf32>
      %28 = vector.shape_cast %27 : vector<16xf32> to vector<16x1xf32>
      %cst_20 = arith.constant 1.280000e+02 : f32
      %29 = vector.broadcast %cst_20 : f32 to vector<16x1xf32>
      %30 = arith.divf %28, %29 : vector<16x1xf32>
      %31 = vector.broadcast %30 : vector<16x1xf32> to vector<16x128xf32>
      %32 = arith.subf %26, %31 : vector<16x128xf32>
      %33 = arith.mulf %32, %32 : vector<16x128xf32>
      %cst_21 = arith.constant dense<0.000000e+00> : vector<16xf32>
      %34 = vector.multi_reduction <add>, %33, %cst_21 [1] : vector<16x128xf32> to vector<16xf32>
      %35 = vector.shape_cast %34 : vector<16xf32> to vector<16x1xf32>
      %cst_22 = arith.constant 1.280000e+02 : f32
      %36 = vector.broadcast %cst_22 : f32 to vector<16x1xf32>
      %37 = arith.divf %35, %36 : vector<16x1xf32>
      %38 = vector.broadcast %30 : vector<16x1xf32> to vector<16x128xf32>
      %39 = arith.subf %26, %38 : vector<16x128xf32>
      %cst_23 = arith.constant 9.99999974E-6 : f32
      %40 = vector.broadcast %cst_23 : f32 to vector<16x1xf32>
      %41 = arith.addf %37, %40 : vector<16x1xf32>
      %42 = math.rsqrt %41 : vector<16x1xf32>
      %43 = vector.broadcast %42 : vector<16x1xf32> to vector<16x128xf32>
      %44 = arith.mulf %39, %43 : vector<16x128xf32>
      %c0_24 = arith.constant 0 : index
      %c0_25 = arith.constant 0 : index
      %45 = vector.load %arg3[%c0_24, %c0_25] : memref<1x128xf32, #tpu.memory_space<vmem>>, vector<1x128xf32>
      %46 = vector.broadcast %45 : vector<1x128xf32> to vector<16x128xf32>
      %47 = arith.mulf %44, %46 : vector<16x128xf32>
      %c0_26 = arith.constant 0 : index
      %c0_27 = arith.constant 0 : index
      %48 = vector.load %arg4[%c0_26, %c0_27] : memref<1x128xf32, #tpu.memory_space<vmem>>, vector<1x128xf32>
      %49 = vector.broadcast %48 : vector<1x128xf32> to vector<16x128xf32>
      %50 = arith.addf %47, %49 : vector<16x128xf32>
      %51 = arith.truncf %50 : vector<16x128xf32> to vector<16x128xbf16>
      %c0_28 = arith.constant 0 : index
      %c0_29 = arith.constant 0 : index
      %52 = vector.load %arg10[%c0_28, %c0_29] : memref<16x128xbf16, #tpu.memory_space<vmem>>, vector<16x128xbf16>
      tpu.vector_store %arg10[%c0_28, %c0_29], %51 {strides = array<i32>} : memref<16x128xbf16, #tpu.memory_space<vmem>>, vector<16x128xbf16>,
      %c0_30 = arith.constant 0 : index
      %c0_31 = arith.constant 0 : index
      %53 = vector.load %arg8[%c0_30, %c0_31] : memref<1x128xf32, #tpu.memory_space<vmem>>, vector<1x128xf32>
      %54 = vector.broadcast %53 : vector<1x128xf32> to vector<16x128xf32>
      %55 = arith.addf %26, %54 : vector<16x128xf32>
      %c0_32 = arith.constant 0 : index
      %c0_33 = arith.constant 0 : index
      %56 = vector.load %arg11[%c0_32, %c0_33] : memref<16x128xf32, #tpu.memory_space<vmem>>, vector<16x128xf32>
      tpu.vector_store %arg11[%c0_32, %c0_33], %55 {strides = array<i32>} : memref<16x128xf32, #tpu.memory_space<vmem>>, vector<16x128xf32>,
    } else {
    }
    %c0 = arith.constant 0 : index
    %c0_1 = arith.constant 0 : index
    %3 = vector.load %arg10[%c0, %c0_1] : memref<16x128xbf16, #tpu.memory_space<vmem>>, vector<16x128xbf16>
    %c0_2 = arith.constant 0 : index
    %c0_3 = arith.constant 0 : index
    %4 = vector.load %arg5[%c0_2, %c0_3] : memref<128x512xbf16, #tpu.memory_space<vmem>>, vector<128x512xbf16>
    %cst = arith.constant dense<0.000000e+00> : vector<16x512xf32>
    %5 = tpu.matmul %3, %4, %cst {dimension_numbers = #tpu.dot_dimension_numbers<[1], [0], [0], [1], [0, 0, 1, 1], [], []>} : vector<16x128xbf16>, vector<128x512xbf16>, vector<16x512xf32> -> vector<16x512xf32>
    %c0_4 = arith.constant 0 : index
    %c0_5 = arith.constant 0 : index
    %6 = vector.load %arg6[%c0_4, %c0_5] : memref<1x512xf32, #tpu.memory_space<vmem>>, vector<1x512xf32>
    %7 = vector.broadcast %6 : vector<1x512xf32> to vector<16x512xf32>
    %8 = arith.addf %5, %7 : vector<16x512xf32>
    %cst_6 = arith.constant 1.702000e+00 : f32
    %9 = vector.broadcast %cst_6 : f32 to vector<16x512xf32>
    %10 = arith.mulf %9, %8 : vector<16x512xf32>
    %11 = arith.negf %10 : vector<16x512xf32>
    %12 = math.exp %11 : vector<16x512xf32>
    %cst_7 = arith.constant 1.000000e+00 : f32
    %13 = vector.broadcast %cst_7 : f32 to vector<16x512xf32>
    %14 = arith.addf %13, %12 : vector<16x512xf32>
    %15 = arith.divf %13, %14 : vector<16x512xf32>
    %16 = arith.mulf %8, %15 : vector<16x512xf32>
    %c0_8 = arith.constant 0 : index
    %c0_9 = arith.constant 0 : index
    %17 = vector.load %arg11[%c0_8, %c0_9] : memref<16x128xf32, #tpu.memory_space<vmem>>, vector<16x128xf32>
    %18 = arith.truncf %16 : vector<16x512xf32> to vector<16x512xbf16>
    %c0_10 = arith.constant 0 : index
    %c0_11 = arith.constant 0 : index
    %19 = vector.load %arg7[%c0_10, %c0_11] : memref<512x128xbf16, #tpu.memory_space<vmem>>, vector<512x128xbf16>
    %cst_12 = arith.constant dense<0.000000e+00> : vector<16x128xf32>
    %20 = tpu.matmul %18, %19, %cst_12 {dimension_numbers = #tpu.dot_dimension_numbers<[1], [0], [0], [1], [0, 0, 1, 1], [], []>} : vector<16x512xbf16>, vector<512x128xbf16>, vector<16x128xf32> -> vector<16x128xf32>
    %21 = arith.addf %17, %20 : vector<16x128xf32>
    %c0_13 = arith.constant 0 : index
    %c0_14 = arith.constant 0 : index
    %22 = vector.load %arg11[%c0_13, %c0_14] : memref<16x128xf32, #tpu.memory_space<vmem>>, vector<16x128xf32>
    tpu.vector_store %arg11[%c0_13, %c0_14], %21 {strides = array<i32>} : memref<16x128xf32, #tpu.memory_space<vmem>>, vector<16x128xf32>,
    %c0_i32_15 = arith.constant 0 : i32
    %23 = arith.cmpi eq, %arg1, %c0_i32_15 : i32
    %24 = arith.extui %23 : i1 to i32
    %c0_i32_16 = arith.constant 0 : i32
    %25 = arith.cmpi ne, %24, %c0_i32_16 : i32
    scf.if %25 {
      %c0_17 = arith.constant 0 : index
      %c0_18 = arith.constant 0 : index
      %26 = vector.load %arg11[%c0_17, %c0_18] : memref<16x128xf32, #tpu.memory_space<vmem>>, vector<16x128xf32>
      %c0_19 = arith.constant 0 : index
      %c0_20 = arith.constant 0 : index
      %27 = vector.load %arg9[%c0_19, %c0_20] : memref<16x128xf32, #tpu.memory_space<vmem>>, vector<16x128xf32>
      tpu.vector_store %arg9[%c0_19, %c0_20], %26 {strides = array<i32>} : memref<16x128xf32, #tpu.memory_space<vmem>>, vector<16x128xf32>,
    } else {
    }
    return
  }
  func.func @transform_0(%arg0: i32, %arg1: i32) -> (i32, i32) {
    %c0_i32 = arith.constant 0 : i32
    %c0_i32_0 = arith.constant 0 : i32
    return %arg0, %c0_i32 : i32, i32
  }
  func.func @transform_1(%arg0: i32, %arg1: i32) -> (i32, i32) {
    %c0_i32 = arith.constant 0 : i32
    %c0_i32_0 = arith.constant 0 : i32
    %c0_i32_1 = arith.constant 0 : i32
    return %c0_i32, %c0_i32_0 : i32, i32
  }
  func.func @transform_2(%arg0: i32, %arg1: i32) -> (i32, i32) {
    %c0_i32 = arith.constant 0 : i32
    %c0_i32_0 = arith.constant 0 : i32
    %c0_i32_1 = arith.constant 0 : i32
    return %c0_i32, %c0_i32_0 : i32, i32
  }
  func.func @transform_3(%arg0: i32, %arg1: i32) -> (i32, i32) {
    %c0_i32 = arith.constant 0 : i32
    %c0_i32_0 = arith.constant 0 : i32
    return %c0_i32, %arg1 : i32, i32
  }
  func.func @transform_4(%arg0: i32, %arg1: i32) -> (i32, i32) {
    %c0_i32 = arith.constant 0 : i32
    %c0_i32_0 = arith.constant 0 : i32
    return %c0_i32, %arg1 : i32, i32
  }
  func.func @transform_5(%arg0: i32, %arg1: i32) -> (i32, i32) {
    %c0_i32 = arith.constant 0 : i32
    %c0_i32_0 = arith.constant 0 : i32
    return %arg1, %c0_i32 : i32, i32
  }
  func.func @transform_6(%arg0: i32, %arg1: i32) -> (i32, i32) {
    %c0_i32 = arith.constant 0 : i32
    %c0_i32_0 = arith.constant 0 : i32
    %c0_i32_1 = arith.constant 0 : i32
    return %c0_i32, %c0_i32_0 : i32, i32
  }
  func.func @transform_7(%arg0: i32, %arg1: i32) -> (i32, i32) {
    %c0_i32 = arith.constant 0 : i32
    %c0_i32_0 = arith.constant 0 : i32
    return %arg0, %c0_i32 : i32, i32
  }
}

</mosaic_0001>

<bundles_post_ra>
// kernel: residual_attention_block.4
= control target key start
LH: loop header
LB: loop body
LE: loop exit
PB: predicated region body
PF: predicated region fallthrough
CT: control target
= control target key end

     0   :  { %11 = vsyncpa [#allocation4], 0  ;;  %s1111_s21 = smov 0   ;;  %s1113_s22 = smov 0   ;;  %s1227_s0 = inlined_call_operand.vmem [shape: f32[1,8,256], index: 0, kind: input, shape index: {}]   ;;  %s1228_s1 = inlined_call_operand.vmem [shape: bf16[1,8,768], index: 1, kind: input, shape index: {}, may-alias: {1,2,3}]   ;;  %s1229_s2 = inlined_call_operand.vmem [shape: bf16[1,8,768], index: 2, kind: input, shape index: {}, may-alias: {1,2,3}]   ;;  %s1230_s3 = inlined_call_operand.vmem [shape: bf16[1,8,768], index: 3, kind: input, shape index: {}, may-alias: {1,2,3}]   ;;  %s1231_s4 = inlined_call_operand.hbm [shape: bf16[128,128], index: 4, kind: input, shape index: {}]   ;;  %s1232_s5 = inlined_call_operand.vmem [shape: f32[1,128], index: 5, kind: input, shape index: {}]   ;;  %s1233_s6 = inlined_call_operand.vmem [shape: f32[1,8,256], index: 6, kind: output, shape index: {}]  }
   0x1   :  { %s1115_s23 = smov 0  }
   0x2 LB: > { %s867_s24 = sadd.s32 4294967295, %s1068_s23   ;;  %s29_s25 = sadd.s32 1, %s1064_s22  ;;  %s1068_s23 = sphi %s1115_s23, %s17_s23   ;;  %s1064_s22 = sphi %s1113_s22, %s1237_s22   ;;  %s1060_s21 = sphi %s1111_s21, %s1236_s21  }
   0x3   : > { %p31_p0 = scmp.ge.s32.totalorder %s29_s25, 2  ;;  %p869_p1 = scmp.ge.s32.totalorder %s1068_s23, 1 }
   0x4   : > { %p227_p2 = scmp.lt.s32.totalorder %s1068_s23, 3  ;;  %p1136_p4 = scmp.eq.s32.totalorder %s867_s24, 0 }
   0x5   : > { %s1239_s25 = smov (%p31_p0, %s29_s25), 0  ;;  %s1070_s28 = smov [#allocation3]  }
   0x6   : > { %p1132_p3 = pnand %p869_p1, %p227_p2  ;;  %s242_s29 = sshll.u32 %s1070_s28, 4  ;;  %s243_s29 = int_to_ptr.vmem [resolvable:$true] %s242_s29 }
   0x7   : > { %s1027_s30 = scalar_lea.vmem %s243_s29, 1024  ;;  %p1035_p11 = scmp.lt.s32.totalorder %s243_s29, %s243_s29 }
   0x8   : > { %p963_p5 = pneg %p1132_p3  ;;  %p1028_p8 = scmp.ne.s32.totalorder %s243_s29, %s1027_s30 }
   0x9   : > { %p1036_p12 = scmp.lt.s32.totalorder %s1027_s30, %s1027_s30 }
   0xa   : > { %p964_p6 = pnand %p1136_p4, %p963_p5 }
   0xb   : > { %p1037_p13 = por %p1036_p12, %p1035_p11 }
   0xc   : > { %p1018_p7 = pneg %p964_p6 }
   0xe   : > { %p1030_p9 = pnand %p1028_p8, %p1018_p7 }
  0x10   : > { %p1031_p10 = pneg %p1030_p9 }
  0x12   : > { %p1038_p0 = pnand %p1037_p13, %p1031_p10 }
  0x14   : > { %1041 = shalt.err (!%p1038_p0)
}
  0x15   : > { %s1071_s7 = smov 64   ;;  %s1072_s8 = smov 4  }
  0x16   : > { %966 = dma.hbm_to_vmem [thread:$0]  (!%p964_p6), %s1231_s4, 1024, %s243_s29, [#allocation4], %s1071_s7, %s1071_s7, %s1072_s8  }
  0x17   : > { %305 = sbr.rel (%p1132_p3) target bundleno = 1586 (0x632), region = 44 }
  0x1c   : > { %1055 = dma.done.wait (%p1136_p4), [#allocation4], 1024  }
  0x1d   : > { %1057 = vsyncadd (%p1136_p4), [#allocation4], 4294966272  ;;  %s1154_s11 = smul.u32 3, %s1060_s21  ;;  %v1073_v0 = vmov 0.0   ;;  %vm1074_vm0 = vmmov 0   ;;  %vm411_vm1 = vcmask 523264  }
  0x1e   : > { %915 = vmatprep.subr.bf16.mxu0 %v1073_v0  ;;  %917 = vmatprep.mubr.msk.bf16.mxu0 %vm1074_vm0, %v1073_v0  ;;  %vm458_vm2 = vcmask 64512   ;;  %s1075_s26 = smov 64   ;;  %vm474_vm3 = vcmask 1043456   ;;  %vm519_vm4 = vcmask 519168   ;;  %v1000_v49 = vld [vmem:[#allocation3 + $0x38] sm:$0xff]   ;;  %v1001_v50 = vld [vmem:[#allocation3 + $0x30] sm:$0xff]  }
  0x1f   : > { %s366_s12 = sadd.s32 1, %s1154_s11  ;;  %p359_p1 = scmp.lt.s32.totalorder %s1154_s11, 5  ;;  %939 = vmatprep.subr.bf16.mxu1 %v1073_v0  ;;  %955 = vmatprep.mubr.msk.bf16.mxu1 %vm1074_vm0, %v1073_v0  ;;  %v1002_v51 = vld [vmem:[#allocation3 + $0x28] sm:$0xff]   ;;  %v1003_v52 = vld [vmem:[#allocation3 + $0x20] sm:$0xff]   ;;  %v1004_v53 = vld [vmem:[#allocation3 + $0x18] sm:$0xff]   ;;  %vm645_vm5 = vcmask 1043968  }
  0x20   : > { %p368_p2 = scmp.lt.s32.totalorder %s366_s12, 5  ;;  %s376_s27 = sadd.s32 2, %s1154_s11  ;;  %940 = vmatpush3.bf16.msra.mxu1 %v1000_v49  ;;  %v1005_v54 = vld [vmem:[#allocation3 + $0x10] sm:$0xff]   ;;  %v1006_v55 = vld [vmem:[#allocation3 + $0x8] sm:$0xff]   ;;  %v1007_v56 = vld [vmem:[#allocation3] sm:$0xff]  }
  0x21   : > { %s360_s13 = scalar_select %p359_p1, %s1154_s11, 5  ;;  %941 = vmatprep.subr.bf16.mxu1 %v1073_v0 }
  0x22   : > { %s1241_s12 = smov (!%p368_p2, %s366_s12), 5  ;;  %p378_p3 = scmp.lt.s32.totalorder %s376_s27, 5 }
  0x23   : > { %s875_s14 = sshll.u32 %s360_s13, 2  ;;  %s876_s15 = sshll.u32 %s1241_s12, 2 }
  0x24   : > { %s362_s18 = scalar_lea.vmem %s1228_s1, %s875_s14  ;;  %s371_s24 = scalar_lea.vmem %s1229_s2, %s876_s15  ;;  %942 = vmatpush3.bf16.msra.mxu1 %v1001_v50 }
  0x25   : > { %v405_v1 = vld [vmem:[%s362_s18] sm:$0xf]  ;;  %s1243_s27 = smov (!%p378_p3, %s376_s27), 5  ;;  %943 = vmatprep.subr.bf16.mxu1 %v1073_v0  ;;  %p353_p4 = scmp.lt.s32.totalorder %s1060_s21, 1 }
  0x26   : > { %v409_v2 = vld [vmem:[%s371_s24] sm:$0xf]  ;;  %v406_v3 = vunpack.c.l.bf16 %v405_v1  ;;  %s877_s28 = sshll.u32 %s1243_s27, 2 }
  0x27   : > { %v416_v4 = vsel %vm411_vm1, %v409_v2, 0  ;;  %v882_v12 = vcombine.low %v409_v2, %v409_v2  ;;  %s381_s7 = scalar_lea.vmem %s1230_s3, %s877_s28  ;;  %s1245_s21 = smov (!%p353_p4, %s1060_s21), 1  ;;  %v879_v1 = vld [vmem:[%s1232_s5] ss:$0 sm:$0xff] }
  0x28   : > { %916 = vmatpush3.bf16.xpose.msra.mxu0 %v416_v4  ;;  %v407_v5 = vmul.f32 0.125, %v406_v3  ;;  %v410_v18 = vld [vmem:[%s381_s7] sm:$0xf]  ;;  %944 = vmatpush3.bf16.msra.mxu1 %v1002_v51  ;;  %s874_s8 = sshll.u32 %s1245_s21, 3 }
  0x29   : > { %921 = vmatprep.subr.bf16.mxu0 %v1073_v0  ;;  %527 = vrot.lane.b32.xlu1 %v882_v12, %s1075_s26  ;;  %v476_v19 = vsel %vm474_vm3, %v410_v18, 0  ;;  %v884_v37 = vcombine.low %v410_v18, %v410_v18  ;;  %s356_s11 = scalar_lea.vmem %s1227_s0, %s874_s8  ;;  %s389_s16 = scalar_lea.vmem %s1233_s6, %s874_s8 }
  0x2a   : > { %v408_v6 = vpack.c.bf16 %v407_v5, %v407_v5  ;;  %945 = vmatprep.subr.bf16.mxu1 %v1073_v0 }
  0x2c   : > { %946 = vmatpush3.bf16.msra.mxu1 %v1003_v52 }
  0x2d   : > { %522 = vrot.lane.b32.xlu1 %v408_v6, %s1075_s26  ;;  %947 = vmatprep.subr.bf16.mxu1 %v1073_v0 }
  0x2f   : > { %918 = vmatmul.mubr.msk.bf16.vlgmr.msra.gmra.mxu0 %vm411_vm1, %v408_v6 }
  0x30   : > { %923 = vmatprep.mubr.msk.bf16.mxu0 %vm1074_vm0, %v1073_v0  ;;  %922 = vmatpush3.bf16.msra.mxu0 %v476_v19 }
  0x31   : > { %927 = vmatprep.subr.bf16.mxu0 %v1073_v0  ;;  %948 = vmatpush3.bf16.msra.mxu1 %v1004_v53 }
  0x32   : > { %949 = vmatprep.subr.bf16.mxu1 %v1073_v0 }
  0x35   : > { %950 = vmatpush3.bf16.msra.mxu1 %v1005_v54 }
  0x36   : > { %951 = vmatprep.subr.bf16.mxu1 %v1073_v0 }
  0x39   : > { %952 = vmatpush3.bf16.msra.mxu1 %v1006_v55 }
  0x3a   : > { %953 = vmatprep.subr.bf16.mxu1 %v1073_v0 }
  0x3d   : > { %954 = vmatpush3.bf16.msra.mxu1 %v1007_v56 }
  0x9b   : > { %v528_v22 = vpop.permute.xlu1 %527 }
  0x9c   : > { %v533_v24 = vsel %vm411_vm1, %v528_v22, 0 }
  0x9f   : > { %v523_v26 = vpop.permute.xlu1 %522 }
  0xef   : > { %v452_v7 = vpop.f32.mrf.mxu0 }
  0xf0   : > { %v459_v8 = vsel %vm458_vm2, %v452_v7, -inf }
  0xf1   : > { %460 = vmax.xlane.f32.xlu0 %v459_v8  ;;  %v919_v9 = vpop.f32.mrf.mxu0 }
  0xf3   : > { %v455_v10 = vpop.f32.mrf.mxu0 }
  0xf5   : > { %v920_v11 = vpop.f32.mrf.mxu0 }
 0x17a   : > { %v461_v13 = vpop.xlane.xlu0 %460 }
 0x17b   : > { %v462_v14 = vsub.f32 %v452_v7, %v461_v13 }
 0x17d   : > { %v463_v15 = vmul.f32 1.442695, %v462_v14 }
 0x17f   : > { %1008 = vpow2.f32 %v463_v15 }
 0x18c   : > { %v1009_v16 = vpop.eup %1008 }
 0x18d   : > { %v465_v17 = vsel %vm458_vm2, %v1009_v16, 0.0 }
 0x18e   : > { %466 = vadd.xlane.f32.xlu0 %v465_v17 }
 0x217   : > { %v467_v20 = vpop.xlane.xlu0 %466 }
 0x218   : > { %1010 = vrcp.f32 %v467_v20 }
 0x225   : > { %v1011_v21 = vpop.eup %1010 }
 0x226   : > { %v469_v23 = vmul.f32 %v1011_v21, %v1009_v16 }
 0x228   : > { %v470_v25 = vpack.c.bf16 %v469_v23, %v469_v23 }
 0x22a   : > { %924 = vmatmul.mubr.msk.bf16.vlgmr.msra.gmra.mxu0 %vm458_vm2, %v470_v25 }
 0x22b   : > { %928 = vmatpush3.bf16.xpose.msra.mxu0 %v533_v24  ;;  %929 = vmatprep.mubr.msk.bf16.mxu0 %vm1074_vm0, %v1073_v0 }
 0x22c   : > { %933 = vmatprep.subr.bf16.mxu0 %v1073_v0 }
 0x232   : > { %930 = vmatmul.mubr.msk.bf16.vlgmr.msra.gmra.mxu0 %vm411_vm1, %v523_v26 }
 0x233   : > { %935 = vmatprep.mubr.msk.bf16.mxu0 %vm1074_vm0, %v1073_v0  ;;  %v395_v0 = vld [vmem:[%s356_s11] sm:$0xff] }
 0x234   : > { %v403_v2 = vadd.f32 %v879_v1, %v395_v0 }
 0x2ea   : > { %v512_v27 = vpop.f32.mrf.mxu0 }
 0x2eb   : > { %v518_v28 = vpack.c.bf16 %v512_v27, %v512_v27 }
 0x2ec   : > { %v925_v29 = vpop.f32.mrf.mxu0 }
 0x2ed   : > { %520 = vst.msk [vmem:[#allocation2] sm:$0xf] %vm519_vm4, %v518_v28 }
 0x2ee   : > { %v515_v30 = vpop.f32.mrf.mxu0 }
 0x2f0   : > { %v926_v31 = vpop.f32.mrf.mxu0 }
 0x2f2   : > { %v569_v32 = vpop.f32.mrf.mxu0 }
 0x2f3   : > { %v575_v33 = vsel %vm458_vm2, %v569_v32, -inf }
 0x2f4   : > { %576 = vmax.xlane.f32.xlu0 %v575_v33  ;;  %v931_v34 = vpop.f32.mrf.mxu0 }
 0x2f6   : > { %v572_v35 = vpop.f32.mrf.mxu0 }
 0x2f8   : > { %v932_v36 = vpop.f32.mrf.mxu0 }
 0x30a   : > { %590 = vrot.lane.b32.xlu0 %v884_v37, %s1075_s26 }
 0x37d   : > { %v577_v38 = vpop.xlane.xlu0 %576 }
 0x37e   : > { %v578_v39 = vsub.f32 %v569_v32, %v577_v38 }
 0x380   : > { %v579_v40 = vmul.f32 1.442695, %v578_v39 }
 0x381   : > { %v591_v43 = vpop.permute.xlu0 %590 }
 0x382   : > { %1012 = vpow2.f32 %v579_v40  ;;  %v596_v44 = vsel %vm474_vm3, %v591_v43, 0 }
 0x383   : > { %934 = vmatpush3.bf16.msra.mxu0 %v596_v44 }
 0x38f   : > { %v1013_v41 = vpop.eup %1012 }
 0x390   : > { %v581_v42 = vsel %vm458_vm2, %v1013_v41, 0.0 }
 0x391   : > { %582 = vadd.xlane.f32.xlu1 %v581_v42 }
 0x41a   : > { %v583_v45 = vpop.xlane.xlu1 %582 }
 0x41b   : > { %1014 = vrcp.f32 %v583_v45 }
 0x428   : > { %v1015_v46 = vpop.eup %1014 }
 0x429   : > { %v585_v47 = vmul.f32 %v1015_v46, %v1013_v41 }
 0x42b   : > { %v586_v48 = vpack.c.bf16 %v585_v47, %v585_v47 }
 0x42d   : > { %936 = vmatmul.mubr.msk.bf16.vlgmr.msra.gmra.mxu0 %vm458_vm2, %v586_v48 }
 0x4ed   : > { %v632_v57 = vpop.f32.mrf.mxu0 }
 0x4ee   : > { %v897_v58 = vpack.c.bf16 %v632_v57, %v632_v57 }
 0x4ef   : > { %v937_v59 = vpop.f32.mrf.mxu0 }
 0x4f0   : > { %642 = vrot.lane.b32.xlu0 %v897_v58, %s1075_s26 }
 0x4f1   : > { %v635_v60 = vpop.f32.mrf.mxu0 }
 0x4f3   : > { %v938_v61 = vpop.f32.mrf.mxu0 }
 0x562   : > { %v643_v62 = vpop.permute.xlu0 %642 }
 0x563   : > { %646 = vst.msk [vmem:[#allocation2] sm:$0xf] %vm645_vm5, %v643_v62 }
 0x56a   : > { %v648_v63 = vld [vmem:[#allocation2] sm:$0xf] }
 0x56b   : > { %956 = vmatmul.mubr.bf16.vlgmr.msra.gmra.mxu1 %v648_v63 }
 0x62b   : > { %v747_v3 = vpop.f32.mrf.mxu1 }
 0x62c   : > { %v753_v4 = vadd.f32 %v747_v3, %v403_v2 }
 0x62d   : > { %v957_v5 = vpop.f32.mrf.mxu1 }
 0x62e   : > { %754 = vst [vmem:[%s389_s16] sm:$0xff] %v753_v4 }
 0x62f   : > { %v750_v6 = vpop.f32.mrf.mxu1 }
 0x631   : > { %v958_v7 = vpop.f32.mrf.mxu1 }
 0x632 PF: > { %s17_s23 = sadd.s32 1, %s1068_s23   ;;  %s1236_s21 = smov %s1064_s22 }
 0x633   : > { %p14_p5 = scmp.ge.s32.totalorder %s17_s23, 4   ;;  %s1237_s22 = smov %s1239_s25 }
 0x635   :  { %16 = sbr.rel (!%p14_p5) target bundleno = 2 (0x2), region = 93 }
 0x63a   :  { %774 = vsyncpa [#allocation4], 1 }
 0x63b   :  { %776 = vsyncpa [#allocation4 + $0x1], 1 }

// kernel: residual_attention_block.3
= control target key start
LH: loop header
LB: loop body
LE: loop exit
PB: predicated region body
PF: predicated region fallthrough
CT: control target
= control target key end

     0   :  { %10 = vsyncpa [#allocation4], 0  ;;  %s528_s18 = smov [#allocation3]   ;;  %s604_s0 = inlined_call_operand.vmem [shape: f32[16,128], index: 0, kind: input, shape index: {}]   ;;  %s605_s1 = inlined_call_operand.vmem [shape: f32[1,128], index: 1, kind: input, shape index: {}]   ;;  %s606_s2 = inlined_call_operand.vmem [shape: f32[1,128], index: 2, kind: input, shape index: {}]   ;;  %s607_s3 = inlined_call_operand.hbm [shape: bf16[128,384], index: 3, kind: input, shape index: {}]   ;;  %s608_s4 = inlined_call_operand.vmem [shape: f32[1,384], index: 4, kind: input, shape index: {}]   ;;  %s609_s5 = inlined_call_operand.vmem [shape: bf16[16,384], index: 5, kind: output, shape index: {}]  }
   0x1   :  { %s22_s19 = sshll.u32 %s528_s18, 4  ;;  %s23_s19 = int_to_ptr.vmem [resolvable:$true] %s22_s19 }
   0x2   :  { %s514_s20 = scalar_lea.vmem %s23_s19, 3072  ;;  %p519_p1 = scmp.lt.s32.totalorder %s23_s19, %s23_s19 }
   0x3   :  { %p515_p0 = scmp.ne.s32.totalorder %s23_s19, %s514_s20  ;;  %p520_p2 = scmp.lt.s32.totalorder %s514_s20, %s514_s20 }
   0x5   :  { %p521_p3 = por %p520_p2, %p519_p1 }
   0x7   :  { %p522_p4 = pnand %p521_p3, %p515_p0 }
   0x9   :  { %525 = shalt.err (!%p522_p4)
}
   0xa   :  { %s529_s21 = smov 192   ;;  %s530_s22 = smov 12  }
   0xb   :  { %28 = dma.hbm_to_vmem [thread:$0]  %s607_s3, 3072, %s23_s19, [#allocation4], %s529_s21, %s529_s21, %s530_s22  }
   0xc   :  { %526 = dma.done.wait [#allocation4], 3072  }
   0xd   :  { %527 = vsyncadd [#allocation4], 4294964224  ;;  %v39_v0 = vld [vmem:[%s604_s0] sm:$0xff]  ;;  %v40_v1 = vld [vmem:[%s604_s0 + $0x8] sm:$0xff]  ;;  %v531_v13 = vmov 0.0   ;;  %v532_v35 = vmov 0   ;;  %v128_v54 = vlaneseq }
   0xe   :  { %41 = vadd.xlane.f32.xlu0 %v39_v0  ;;  %v469_v10 = vld [vmem:[#allocation3 + $0xac] ss:$12 sps:$4 sm:$0xff]   ;;  %v471_v11 = vld [vmem:[#allocation3 + $0xa8] ss:$12 sps:$4 sm:$0xff]   ;;  %v472_v12 = vld [vmem:[#allocation3 + $0xb0] ss:$12 sps:$4 sm:$0xff]   ;;  %443 = vmatprep.subr.bf16.mxu1 %v531_v13 }
   0xf   :  { %277 = vmatprep.subr.bf16.mxu0 %v469_v10  ;;  %444 = vmatpush3.bf16.msra.mxu1 %v472_v12  ;;  %v473_v14 = vld [vmem:[#allocation3 + $0x94] ss:$12 sps:$4 sm:$0xff]   ;;  %v475_v15 = vld [vmem:[#allocation3 + $0x90] ss:$12 sps:$4 sm:$0xff]   ;;  %v476_v16 = vld [vmem:[#allocation3 + $0x98] ss:$12 sps:$4 sm:$0xff]  }
  0x10   :  { %278 = vmatpush1.bf16.msra.mxu0 %v471_v11  ;;  %445 = vmatprep.subr.bf16.mxu1 %v531_v13  ;;  %v477_v17 = vld [vmem:[#allocation3 + $0x7c] ss:$12 sps:$4 sm:$0xff]   ;;  %v479_v18 = vld [vmem:[#allocation3 + $0x78] ss:$12 sps:$4 sm:$0xff]   ;;  %v480_v19 = vld [vmem:[#allocation3 + $0x80] ss:$12 sps:$4 sm:$0xff]  }
  0x11   :  { %279 = vmatprep.subr.bf16.mxu0 %v473_v14  ;;  %v481_v20 = vld [vmem:[#allocation3 + $0x64] ss:$12 sps:$4 sm:$0xff]   ;;  %v483_v21 = vld [vmem:[#allocation3 + $0x60] ss:$12 sps:$4 sm:$0xff]   ;;  %v484_v22 = vld [vmem:[#allocation3 + $0x68] ss:$12 sps:$4 sm:$0xff]   ;;  %309 = vmatprep.mubr.bf16.mxu0 %v532_v35 }
  0x12   :  { %43 = vadd.xlane.f32.xlu0 %v40_v1  ;;  %v485_v23 = vld [vmem:[#allocation3 + $0x4c] ss:$12 sps:$4 sm:$0xff]   ;;  %v487_v24 = vld [vmem:[#allocation3 + $0x48] ss:$12 sps:$4 sm:$0xff]   ;;  %v488_v25 = vld [vmem:[#allocation3 + $0x50] ss:$12 sps:$4 sm:$0xff]  }
  0x13   :  { %446 = vmatpush3.bf16.msra.mxu1 %v476_v16  ;;  %v489_v26 = vld [vmem:[#allocation3 + $0x34] ss:$12 sps:$4 sm:$0xff]   ;;  %v491_v27 = vld [vmem:[#allocation3 + $0x30] ss:$12 sps:$4 sm:$0xff]   ;;  %v492_v28 = vld [vmem:[#allocation3 + $0x38] ss:$12 sps:$4 sm:$0xff]  }
  0x14   :  { %280 = vmatpush1.bf16.msra.mxu0 %v475_v15  ;;  %447 = vmatprep.subr.bf16.mxu1 %v531_v13  ;;  %v493_v29 = vld [vmem:[#allocation3 + $0x1c] ss:$12 sps:$4 sm:$0xff]   ;;  %v495_v30 = vld [vmem:[#allocation3 + $0x18] ss:$12 sps:$4 sm:$0xff]   ;;  %v496_v31 = vld [vmem:[#allocation3 + $0x20] ss:$12 sps:$4 sm:$0xff]  }
  0x15   :  { %281 = vmatprep.subr.bf16.mxu0 %v477_v17  ;;  %v497_v32 = vld [vmem:[#allocation3 + $0x4] ss:$12 sps:$4 sm:$0xff]   ;;  %v499_v33 = vld [vmem:[#allocation3] ss:$12 sps:$4 sm:$0xff]   ;;  %v500_v34 = vld [vmem:[#allocation3 + $0x8] ss:$12 sps:$4 sm:$0xff]  }
  0x16   :  { %vm533_vm0 = vmmov 0   ;;  %v390_v44 = vld [vmem:[%s605_s1] ss:$0 sm:$0xff]  ;;  %v129_v55 = vshrl.u32 %v128_v54, 7 }
  0x17   :  { %448 = vmatpush3.bf16.msra.mxu1 %v480_v19  ;;  %459 = vmatprep.mubr.msk.bf16.mxu1 %vm533_vm0, %v531_v13  ;;  %v391_v48 = vld [vmem:[%s606_s2] ss:$0 sm:$0xff] }
  0x18   :  { %282 = vmatpush1.bf16.msra.mxu0 %v479_v18  ;;  %449 = vmatprep.subr.bf16.mxu1 %v531_v13  ;;  %v138_v56 = vsub.s32 2, %v129_v55  ;;  %v126_v57 = vld [vmem:[%s608_s4] sm:$0x7]  ;;  %v130_v58 = vsub.s32 0, %v129_v55  ;;  %v134_v59 = vsub.s32 1, %v129_v55 }
  0x19   :  { %283 = vmatprep.subr.bf16.mxu0 %v481_v20 }
  0x1a   :  { %v139_v60 = vrot.slane %v126_v57, %v138_v56  ;;  %v131_v61 = vrot.slane %v126_v57, %v130_v58  ;;  %v135_v62 = vrot.slane %v126_v57, %v134_v59 }
  0x1b   :  { %450 = vmatpush3.bf16.msra.mxu1 %v484_v22 }
  0x1c   :  { %284 = vmatpush1.bf16.msra.mxu0 %v483_v21  ;;  %451 = vmatprep.subr.bf16.mxu1 %v531_v13 }
  0x1d   :  { %285 = vmatprep.subr.bf16.mxu0 %v485_v23 }
  0x1f   :  { %452 = vmatpush3.bf16.msra.mxu1 %v488_v25 }
  0x20   :  { %286 = vmatpush1.bf16.msra.mxu0 %v487_v24  ;;  %453 = vmatprep.subr.bf16.mxu1 %v531_v13 }
  0x21   :  { %287 = vmatprep.subr.bf16.mxu0 %v489_v26 }
  0x23   :  { %454 = vmatpush3.bf16.msra.mxu1 %v492_v28 }
  0x24   :  { %288 = vmatpush1.bf16.msra.mxu0 %v491_v27  ;;  %455 = vmatprep.subr.bf16.mxu1 %v531_v13 }
  0x25   :  { %289 = vmatprep.subr.bf16.mxu0 %v493_v29 }
  0x27   :  { %456 = vmatpush3.bf16.msra.mxu1 %v496_v31 }
  0x28   :  { %290 = vmatpush1.bf16.msra.mxu0 %v495_v30  ;;  %457 = vmatprep.subr.bf16.mxu1 %v531_v13 }
  0x29   :  { %291 = vmatprep.subr.bf16.mxu0 %v497_v32 }
  0x2b   :  { %458 = vmatpush3.bf16.msra.mxu1 %v500_v34 }
  0x2c   :  { %292 = vmatpush1.bf16.msra.mxu0 %v499_v33 }
  0x97   :  { %v42_v2 = vpop.xlane.xlu0 %41 }
  0x98   :  { %v46_v3 = vmul.f32 0.0078125, %v42_v2 }
  0x9a   :  { %v573_v4 = vsub.f32 %v39_v0, %v46_v3 }
  0x9b   :  { %v44_v5 = vpop.xlane.xlu0 %43 }
  0x9c   :  { %v47_v6 = vmul.f32 0.0078125, %v44_v5  ;;  %v50_v7 = vmul.f32 %v573_v4, %v573_v4 }
  0x9e   :  { %v577_v8 = vsub.f32 %v40_v1, %v47_v6  ;;  %52 = vadd.xlane.f32.xlu1 %v50_v7 }
  0xa0   :  { %v51_v9 = vmul.f32 %v577_v8, %v577_v8 }
  0xa2   :  { %54 = vadd.xlane.f32.xlu1 %v51_v9 }
 0x127   :  { %v53_v36 = vpop.xlane.xlu1 %52 }
 0x128   :  { %v56_v37 = vmul.f32 0.0078125, %v53_v36 }
 0x12a   :  { %v58_v38 = vadd.f32 1e-05, %v56_v37 }
 0x12b   :  { %v55_v39 = vpop.xlane.xlu1 %54 }
 0x12c   :  { %502 = vrsqrt.f32 %v58_v38  ;;  %v57_v40 = vmul.f32 0.0078125, %v55_v39 }
 0x12e   :  { %v59_v41 = vadd.f32 1e-05, %v57_v40 }
 0x130   :  { %504 = vrsqrt.f32 %v59_v41 }
 0x139   :  { %v503_v42 = vpop.eup %502 }
 0x13a   :  { %v62_v43 = vmul.f32 %v503_v42, %v573_v4 }
 0x13c   :  { %v71_v46 = vmul.f32 %v390_v44, %v62_v43 }
 0x13d   :  { %v505_v45 = vpop.eup %504 }
 0x13e   :  { %v63_v47 = vmul.f32 %v505_v45, %v577_v8  ;;  %v80_v50 = vadd.f32 %v391_v48, %v71_v46 }
 0x140   :  { %v72_v49 = vmul.f32 %v390_v44, %v63_v47 }
 0x142   :  { %v81_v51 = vadd.f32 %v391_v48, %v72_v49 }
 0x144   :  { %v432_v52 = vpack.c.bf16 %v81_v51, %v80_v50 }
 0x146   :  { %433 = vst [vmem:[#allocation2] sm:$0xff] %v432_v52  }
 0x14d   :  { %v501_v53 = vld [vmem:[#allocation2] sm:$0xff]  }
 0x14e   :  { %310 = vmatmul.mubr.bf16.vlgmr.msra.gmra.mxu0 %v501_v53  ;;  %460 = vmatmul.mubr.bf16.vlgmr.msra.gmra.mxu1 %v501_v53 }
 0x20e   :  { %v311_v63 = vpop.f32.mrf.mxu0  ;;  %v354_v0 = vpop.f32.mrf.mxu1 }
 0x20f   :  { %v355_v1 = vadd.f32 %v354_v0, %v139_v60  ;;  %v312_v4 = vadd.f32 %v311_v63, %v131_v61 }
 0x210   :  { %v313_v2 = vpop.f32.mrf.mxu0  ;;  %v461_v3 = vpop.f32.mrf.mxu1 }
 0x211   :  { %v426_v5 = vpack.c.bf16 %v355_v1, %v355_v1  ;;  %v314_v6 = vadd.f32 %v313_v2, %v135_v62 }
 0x212   :  { %v315_v7 = vpop.f32.mrf.mxu0  ;;  %v357_v8 = vpop.f32.mrf.mxu1 }
 0x213   :  { %382 = vst [vmem:[%s609_s5 + $0x8] sm:$0xf] %v426_v5  ;;  %v425_v9 = vpack.c.bf16 %v314_v6, %v312_v4  ;;  %v358_v10 = vadd.f32 %v357_v8, %v139_v60  ;;  %v316_v13 = vadd.f32 %v315_v7, %v131_v61 }
 0x214   :  { %v317_v11 = vpop.f32.mrf.mxu0  ;;  %v462_v12 = vpop.f32.mrf.mxu1 }
 0x215   :  { %381 = vst [vmem:[%s609_s5] sm:$0xff] %v425_v9  ;;  %v428_v14 = vpack.c.bf16 %v358_v10, %v358_v10  ;;  %v318_v15 = vadd.f32 %v317_v11, %v135_v62 }
 0x217   :  { %384 = vst [vmem:[%s609_s5 + $0x14] sm:$0xf] %v428_v14  ;;  %v427_v16 = vpack.c.bf16 %v318_v15, %v316_v13 }
 0x219   :  { %383 = vst [vmem:[%s609_s5 + $0xc] sm:$0xff] %v427_v16 }
 0x21a   :  { %389 = vsyncpa [#allocation4], 1 }

// kernel: residual_attention_block.5
= control target key start
LH: loop header
LB: loop body
LE: loop exit
PB: predicated region body
PF: predicated region fallthrough
CT: control target
= control target key end

     0   :  { %12 = vsyncpa [#allocation5], 0  ;;  %s1441_s0 = inlined_call_operand.vmem [shape: f32[16,128], index: 0, kind: input, shape index: {}]   ;;  %s1442_s1 = inlined_call_operand.vmem [shape: f32[1,128], index: 1, kind: input, shape index: {}]   ;;  %s1443_s2 = inlined_call_operand.vmem [shape: f32[1,128], index: 2, kind: input, shape index: {}]   ;;  %s1444_s3 = inlined_call_operand.vmem [shape: bf16[128,512], index: 3, kind: input, shape index: {}]   ;;  %s1445_s4 = inlined_call_operand.vmem [shape: f32[1,512], index: 4, kind: input, shape index: {}]   ;;  %s1446_s5 = inlined_call_operand.vmem [shape: bf16[512,128], index: 5, kind: input, shape index: {}]   ;;  %s1447_s6 = inlined_call_operand.hbm [shape: f32[1,128], index: 6, kind: input, shape index: {}]   ;;  %s1448_s7 = inlined_call_operand.hbm [shape: f32[16,128], index: 7, kind: output, shape index: {}]  }
   0x1   :  { %13 = vsyncpa [#allocation6], 0  ;;  %s1147_s24 = smov [#allocation4]  }
   0x2   :  { %s32_s25 = sshll.u32 %s1147_s24, 4  ;;  %s33_s25 = int_to_ptr.vmem [resolvable:$true] %s32_s25 }
   0x3   :  { %s1111_s26 = scalar_lea.vmem %s33_s25, 16  ;;  %s1115_s27 = scalar_lea.vmem %s33_s25, 32 }
   0x4   :  { %p1112_p0 = scmp.ne.s32.totalorder %s33_s25, %s1111_s26  ;;  %p1116_p1 = scmp.lt.s32.totalorder %s33_s25, %s33_s25 }
   0x5   :  { %p1117_p2 = scmp.lt.s32.totalorder %s1115_s27, %s1111_s26 }
   0x7   :  { %p1118_p3 = por %p1117_p2, %p1116_p1 }
   0x9   :  { %p1119_p4 = pnand %p1118_p3, %p1112_p0 }
   0xb   :  { %1122 = shalt.err (!%p1119_p4)
}
   0xc   :  { %35 = dma.hbm_to_vmem [thread:$0]  %s1447_s6, 16, %s33_s25, [#allocation5]  }
   0xd   :  { %1143 = dma.done.wait [#allocation5], 16  }
   0xe   :  { %1144 = vsyncadd [#allocation5], 4294967280  ;;  %v1198_v0 = vld [vmem:[%s1441_s0] sm:$0xff]  ;;  %v1203_v1 = vld [vmem:[%s1441_s0 + $0x8] sm:$0xff]  ;;  %v1148_v42 = vmov 0  }
   0xf   :  { %46 = vadd.xlane.f32.xlu0 %v1198_v0  ;;  %v986_v10 = vld [vmem:[%s1444_s3 + $0xe4] ss:$16 sps:$4 sm:$0xff]   ;;  %v988_v11 = vld [vmem:[%s1444_s3 + $0xec] ss:$16 sps:$4 sm:$0xff]   ;;  %v990_v12 = vld [vmem:[%s1444_s3 + $0xe0] ss:$16 sps:$4 sm:$0xff]   ;;  %362 = vmatprep.mubr.bf16.mxu0 %v1148_v42 }
  0x10   :  { %v991_v13 = vld [vmem:[%s1444_s3 + $0xe8] ss:$16 sps:$4 sm:$0xff]   ;;  %330 = vmatprep.subr.bf16.mxu0 %v986_v10  ;;  %373 = vmatprep.subr.bf16.mxu1 %v988_v11  ;;  %v992_v14 = vld [vmem:[%s1444_s3 + $0xc4] ss:$16 sps:$4 sm:$0xff]   ;;  %v994_v15 = vld [vmem:[%s1444_s3 + $0xcc] ss:$16 sps:$4 sm:$0xff]  }
  0x11   :  { %331 = vmatpush1.bf16.msra.mxu0 %v990_v12  ;;  %374 = vmatpush1.bf16.msra.mxu1 %v991_v13  ;;  %v996_v16 = vld [vmem:[%s1444_s3 + $0xc0] ss:$16 sps:$4 sm:$0xff]   ;;  %v997_v17 = vld [vmem:[%s1444_s3 + $0xc8] ss:$16 sps:$4 sm:$0xff]   ;;  %v998_v18 = vld [vmem:[%s1444_s3 + $0xa4] ss:$16 sps:$4 sm:$0xff]  }
  0x12   :  { %332 = vmatprep.subr.bf16.mxu0 %v992_v14  ;;  %375 = vmatprep.subr.bf16.mxu1 %v994_v15  ;;  %v1000_v19 = vld [vmem:[%s1444_s3 + $0xac] ss:$16 sps:$4 sm:$0xff]   ;;  %v1002_v20 = vld [vmem:[%s1444_s3 + $0xa0] ss:$16 sps:$4 sm:$0xff]   ;;  %v1003_v21 = vld [vmem:[%s1444_s3 + $0xa8] ss:$16 sps:$4 sm:$0xff]  }
  0x13   :  { %48 = vadd.xlane.f32.xlu0 %v1203_v1  ;;  %v1004_v22 = vld [vmem:[%s1444_s3 + $0x84] ss:$16 sps:$4 sm:$0xff]   ;;  %v1006_v23 = vld [vmem:[%s1444_s3 + $0x8c] ss:$16 sps:$4 sm:$0xff]   ;;  %v1008_v24 = vld [vmem:[%s1444_s3 + $0x80] ss:$16 sps:$4 sm:$0xff]   ;;  %405 = vmatprep.mubr.bf16.mxu1 %v1148_v42 }
  0x14   :  { %v1009_v25 = vld [vmem:[%s1444_s3 + $0x88] ss:$16 sps:$4 sm:$0xff]   ;;  %v1010_v26 = vld [vmem:[%s1444_s3 + $0x64] ss:$16 sps:$4 sm:$0xff]   ;;  %v1012_v27 = vld [vmem:[%s1444_s3 + $0x6c] ss:$16 sps:$4 sm:$0xff]  }
  0x15   :  { %333 = vmatpush1.bf16.msra.mxu0 %v996_v16  ;;  %376 = vmatpush1.bf16.msra.mxu1 %v997_v17  ;;  %v1014_v28 = vld [vmem:[%s1444_s3 + $0x60] ss:$16 sps:$4 sm:$0xff]   ;;  %v1015_v29 = vld [vmem:[%s1444_s3 + $0x68] ss:$16 sps:$4 sm:$0xff]   ;;  %v1016_v30 = vld [vmem:[%s1444_s3 + $0x44] ss:$16 sps:$4 sm:$0xff]  }
  0x16   :  { %334 = vmatprep.subr.bf16.mxu0 %v998_v18  ;;  %377 = vmatprep.subr.bf16.mxu1 %v1000_v19  ;;  %v1018_v31 = vld [vmem:[%s1444_s3 + $0x4c] ss:$16 sps:$4 sm:$0xff]   ;;  %v1020_v32 = vld [vmem:[%s1444_s3 + $0x40] ss:$16 sps:$4 sm:$0xff]   ;;  %v1021_v33 = vld [vmem:[%s1444_s3 + $0x48] ss:$16 sps:$4 sm:$0xff]  }
  0x17   :  { %v1022_v34 = vld [vmem:[%s1444_s3 + $0x24] ss:$16 sps:$4 sm:$0xff]   ;;  %v1024_v35 = vld [vmem:[%s1444_s3 + $0x2c] ss:$16 sps:$4 sm:$0xff]   ;;  %v1026_v36 = vld [vmem:[%s1444_s3 + $0x20] ss:$16 sps:$4 sm:$0xff]  }
  0x18   :  { %v1027_v37 = vld [vmem:[%s1444_s3 + $0x28] ss:$16 sps:$4 sm:$0xff]   ;;  %v1028_v38 = vld [vmem:[%s1444_s3 + $0x4] ss:$16 sps:$4 sm:$0xff]   ;;  %v1030_v39 = vld [vmem:[%s1444_s3 + $0xc] ss:$16 sps:$4 sm:$0xff]  }
  0x19   :  { %335 = vmatpush1.bf16.msra.mxu0 %v1002_v20  ;;  %378 = vmatpush1.bf16.msra.mxu1 %v1003_v21  ;;  %v1032_v40 = vld [vmem:[%s1444_s3] ss:$16 sps:$4 sm:$0xff]   ;;  %v1033_v41 = vld [vmem:[%s1444_s3 + $0x8] ss:$16 sps:$4 sm:$0xff]  }
  0x1a   :  { %336 = vmatprep.subr.bf16.mxu0 %v1004_v22  ;;  %379 = vmatprep.subr.bf16.mxu1 %v1006_v23  ;;  %v852_v51 = vld [vmem:[%s1442_s1] ss:$0 sm:$0xff]  ;;  %v1035_v61 = vld [vmem:[%s1446_s5 + $0x78] sm:$0xff]   ;;  %v1046_v10 = vld [vmem:[%s1446_s5 + $0xa8] sm:$0xff]  }
  0x1b   :  { %v853_v55 = vld [vmem:[%s1443_s2] ss:$0 sm:$0xff]  ;;  %v1036_v62 = vld [vmem:[%s1446_s5 + $0xf8] sm:$0xff]   ;;  %v1055_v19 = vld [vmem:[%s1446_s5 + $0x50] sm:$0xff]  }
  0x1c   :  { %v1037_v63 = vld [vmem:[%s1446_s5 + $0x38] sm:$0xff]   ;;  %v1047_v11 = vld [vmem:[%s1446_s5 + $0x60] sm:$0xff]   ;;  %v1056_v20 = vld [vmem:[%s1446_s5 + $0xd0] sm:$0xff]  }
  0x1d   :  { %337 = vmatpush1.bf16.msra.mxu0 %v1008_v24  ;;  %380 = vmatpush1.bf16.msra.mxu1 %v1009_v25  ;;  %v1048_v12 = vld [vmem:[%s1446_s5 + $0xe0] sm:$0xff]   ;;  %v1051_v15 = vld [vmem:[%s1446_s5 + $0x58] sm:$0xff]   ;;  %v1057_v21 = vld [vmem:[%s1446_s5 + $0x10] sm:$0xff]  }
  0x1e   :  { %338 = vmatprep.subr.bf16.mxu0 %v1010_v26  ;;  %381 = vmatprep.subr.bf16.mxu1 %v1012_v27  ;;  %v1049_v13 = vld [vmem:[%s1446_s5 + $0x20] sm:$0xff]   ;;  %v1052_v16 = vld [vmem:[%s1446_s5 + $0xd8] sm:$0xff]   ;;  %v1058_v22 = vld [vmem:[%s1446_s5 + $0x90] sm:$0xff]  }
  0x1f   :  { %v1050_v14 = vld [vmem:[%s1446_s5 + $0xa0] sm:$0xff]   ;;  %v1053_v17 = vld [vmem:[%s1446_s5 + $0x18] sm:$0xff]   ;;  %v1059_v23 = vld [vmem:[%s1446_s5 + $0x48] sm:$0xff]  }
  0x20   :  { %v1054_v18 = vld [vmem:[%s1446_s5 + $0x98] sm:$0xff]   ;;  %v1060_v24 = vld [vmem:[%s1446_s5 + $0xc8] sm:$0xff]   ;;  %v1063_v27 = vld [vmem:[%s1446_s5 + $0x40] sm:$0xff]  }
  0x21   :  { %339 = vmatpush1.bf16.msra.mxu0 %v1014_v28  ;;  %382 = vmatpush1.bf16.msra.mxu1 %v1015_v29  ;;  %v1061_v25 = vld [vmem:[%s1446_s5 + $0x8] sm:$0xff]   ;;  %v1064_v28 = vld [vmem:[%s1446_s5 + $0xc0] sm:$0xff]  }
  0x22   :  { %340 = vmatprep.subr.bf16.mxu0 %v1016_v30  ;;  %383 = vmatprep.subr.bf16.mxu1 %v1018_v31  ;;  %v1062_v26 = vld [vmem:[%s1446_s5 + $0x88] sm:$0xff]   ;;  %v1065_v29 = vld [vmem:[%s1446_s5] sm:$0xff]   ;;  %v144_v31 = vlaneseq }
  0x23   :  { %v1066_v30 = vld [vmem:[%s1446_s5 + $0x80] sm:$0xff]  }
  0x25   :  { %341 = vmatpush1.bf16.msra.mxu0 %v1020_v32  ;;  %384 = vmatpush1.bf16.msra.mxu1 %v1021_v33  ;;  %v145_v32 = vshrl.u32 %v144_v31, 7 }
  0x26   :  { %342 = vmatprep.subr.bf16.mxu0 %v1022_v34  ;;  %385 = vmatprep.subr.bf16.mxu1 %v1024_v35  ;;  %v142_v35 = vld [vmem:[%s1445_s4] sm:$0xf]  ;;  %s1149_s4 = smov [#allocation7]  }
  0x27   :  { %v146_v33 = vsub.s32 0, %v145_v32  ;;  %v154_v34 = vsub.s32 2, %v145_v32 }
  0x29   :  { %343 = vmatpush1.bf16.msra.mxu0 %v1026_v36  ;;  %386 = vmatpush1.bf16.msra.mxu1 %v1027_v37  ;;  %v150_v36 = vsub.s32 1, %v145_v32  ;;  %v158_v37 = vsub.s32 3, %v145_v32 }
  0x2a   :  { %344 = vmatprep.subr.bf16.mxu0 %v1028_v38  ;;  %387 = vmatprep.subr.bf16.mxu1 %v1030_v39  ;;  %v147_v38 = vrot.slane %v142_v35, %v146_v33  ;;  %v155_v39 = vrot.slane %v142_v35, %v154_v34 }
  0x2d   :  { %345 = vmatpush1.bf16.msra.mxu0 %v1032_v40  ;;  %388 = vmatpush1.bf16.msra.mxu1 %v1033_v41  ;;  %v151_v40 = vrot.slane %v142_v35, %v150_v36  ;;  %v159_v41 = vrot.slane %v142_v35, %v158_v37 }
  0x2e   :  { %937 = vmatprep.subr.bf16.mxu0 %v1035_v61  ;;  %959 = vmatprep.subr.bf16.mxu1 %v1036_v62 }
  0x98   :  { %v47_v2 = vpop.xlane.xlu0 %46 }
  0x99   :  { %v51_v3 = vmul.f32 0.0078125, %v47_v2  ;;  %v1038_v2 = vld [vmem:[%s1446_s5 + $0xb8] sm:$0xff]  }
  0x9b   :  { %v1208_v4 = vsub.f32 %v1198_v0, %v51_v3  ;;  %v1039_v3 = vld [vmem:[%s1446_s5 + $0x70] sm:$0xff]  }
  0x9c   :  { %v49_v5 = vpop.xlane.xlu0 %48 }
  0x9d   :  { %v52_v6 = vmul.f32 0.0078125, %v49_v5  ;;  %v55_v7 = vmul.f32 %v1208_v4, %v1208_v4  ;;  %v1041_v5 = vld [vmem:[%s1446_s5 + $0x30] sm:$0xff]  }
  0x9f   :  { %v1213_v8 = vsub.f32 %v1203_v1, %v52_v6  ;;  %57 = vadd.xlane.f32.xlu1 %v55_v7  ;;  %v1042_v6 = vld [vmem:[%s1446_s5 + $0xb0] sm:$0xff]   ;;  %v1043_v7 = vld [vmem:[%s1446_s5 + $0x68] sm:$0xff]  }
  0xa1   :  { %v56_v9 = vmul.f32 %v1213_v8, %v1213_v8 }
  0xa3   :  { %59 = vadd.xlane.f32.xlu1 %v56_v9  ;;  %v1045_v9 = vld [vmem:[%s1446_s5 + $0x28] sm:$0xff]  }
 0x128   :  { %v58_v43 = vpop.xlane.xlu1 %57 }
 0x129   :  { %v61_v44 = vmul.f32 0.0078125, %v58_v43 }
 0x12b   :  { %v63_v45 = vadd.f32 1e-05, %v61_v44 }
 0x12c   :  { %v60_v46 = vpop.xlane.xlu1 %59 }
 0x12d   :  { %1067 = vrsqrt.f32 %v63_v45  ;;  %v62_v47 = vmul.f32 0.0078125, %v60_v46 }
 0x12f   :  { %v64_v48 = vadd.f32 1e-05, %v62_v47 }
 0x131   :  { %1069 = vrsqrt.f32 %v64_v48 }
 0x13a   :  { %v1068_v49 = vpop.eup %1067 }
 0x13b   :  { %v67_v50 = vmul.f32 %v1068_v49, %v1208_v4  ;;  %v1040_v4 = vld [vmem:[%s1446_s5 + $0xf0] sm:$0xff]  }
 0x13d   :  { %v76_v53 = vmul.f32 %v852_v51, %v67_v50 }
 0x13e   :  { %v1070_v52 = vpop.eup %1069 }
 0x13f   :  { %v68_v54 = vmul.f32 %v1070_v52, %v1213_v8  ;;  %v85_v57 = vadd.f32 %v853_v55, %v76_v53  ;;  %v1044_v8 = vld [vmem:[%s1446_s5 + $0xe8] sm:$0xff]   ;;  %s840_s5 = sshll.u32 %s1149_s4, 4  ;;  %s841_s5 = int_to_ptr.vmem [resolvable:$true] %s840_s5 }
 0x140   :  { %s1123_s0 = scalar_lea.vmem %s841_s5, 256  ;;  %p1128_p6 = scmp.lt.s32.totalorder %s841_s5, %s841_s5 }
 0x141   :  { %v77_v56 = vmul.f32 %v852_v51, %v68_v54  ;;  %p1124_p5 = scmp.ne.s32.totalorder %s841_s5, %s1123_s0  ;;  %p1129_p7 = scmp.lt.s32.totalorder %s1123_s0, %s1123_s0 }
 0x143   :  { %v86_v58 = vadd.f32 %v853_v55, %v77_v56  ;;  %p1130_p8 = por %p1129_p7, %p1128_p6 }
 0x145   :  { %v935_v59 = vpack.c.bf16 %v86_v58, %v85_v57  ;;  %p1131_p9 = pnand %p1130_p8, %p1124_p5 }
 0x147   :  { %936 = vst [vmem:[#allocation2] sm:$0xff] %v935_v59  }
 0x14e   :  { %v1034_v60 = vld [vmem:[#allocation2] sm:$0xff]  }
 0x14f   :  { %363 = vmatmul.mubr.bf16.vlgmr.msra.gmra.mxu0 %v1034_v60  ;;  %406 = vmatmul.mubr.bf16.vlgmr.msra.gmra.mxu1 %v1034_v60 }
 0x150   :  { %938 = vmatpush3.bf16.msra.mxu0 %v1037_v63  ;;  %960 = vmatpush3.bf16.msra.mxu1 %v1038_v2 }
 0x151   :  { %939 = vmatprep.subr.bf16.mxu0 %v1039_v3  ;;  %961 = vmatprep.subr.bf16.mxu1 %v1040_v4 }
 0x154   :  { %940 = vmatpush3.bf16.msra.mxu0 %v1041_v5  ;;  %962 = vmatpush3.bf16.msra.mxu1 %v1042_v6 }
 0x155   :  { %941 = vmatprep.subr.bf16.mxu0 %v1043_v7  ;;  %963 = vmatprep.subr.bf16.mxu1 %v1044_v8 }
 0x158   :  { %942 = vmatpush3.bf16.msra.mxu0 %v1045_v9  ;;  %964 = vmatpush3.bf16.msra.mxu1 %v1046_v10 }
 0x159   :  { %943 = vmatprep.subr.bf16.mxu0 %v1047_v11  ;;  %965 = vmatprep.subr.bf16.mxu1 %v1048_v12 }
 0x15c   :  { %944 = vmatpush3.bf16.msra.mxu0 %v1049_v13  ;;  %966 = vmatpush3.bf16.msra.mxu1 %v1050_v14 }
 0x15d   :  { %945 = vmatprep.subr.bf16.mxu0 %v1051_v15  ;;  %967 = vmatprep.subr.bf16.mxu1 %v1052_v16 }
 0x160   :  { %946 = vmatpush3.bf16.msra.mxu0 %v1053_v17  ;;  %968 = vmatpush3.bf16.msra.mxu1 %v1054_v18 }
 0x161   :  { %947 = vmatprep.subr.bf16.mxu0 %v1055_v19  ;;  %969 = vmatprep.subr.bf16.mxu1 %v1056_v20 }
 0x164   :  { %948 = vmatpush3.bf16.msra.mxu0 %v1057_v21  ;;  %970 = vmatpush3.bf16.msra.mxu1 %v1058_v22 }
 0x165   :  { %949 = vmatprep.subr.bf16.mxu0 %v1059_v23  ;;  %971 = vmatprep.subr.bf16.mxu1 %v1060_v24 }
 0x168   :  { %950 = vmatpush3.bf16.msra.mxu0 %v1061_v25  ;;  %972 = vmatpush3.bf16.msra.mxu1 %v1062_v26 }
 0x169   :  { %951 = vmatprep.subr.bf16.mxu0 %v1063_v27  ;;  %973 = vmatprep.subr.bf16.mxu1 %v1064_v28 }
 0x16c   :  { %952 = vmatpush3.bf16.msra.mxu0 %v1065_v29  ;;  %974 = vmatpush3.bf16.msra.mxu1 %v1066_v30 }
 0x20f   :  { %v364_v42 = vpop.f32.mrf.mxu0  ;;  %v407_v43 = vpop.f32.mrf.mxu1 }
 0x210   :  { %v1420_v44 = vadd.f32 %v364_v42, %v147_v38  ;;  %v1422_v45 = vadd.f32 %v407_v43, %v155_v39 }
 0x211   :  { %v366_v46 = vpop.f32.mrf.mxu0  ;;  %v409_v47 = vpop.f32.mrf.mxu1 }
 0x212   :  { %v890_v48 = vmul.f32 -1.702, %v1420_v44  ;;  %v892_v49 = vmul.f32 -1.702, %v1422_v45  ;;  %v1426_v50 = vadd.f32 %v366_v46, %v151_v40  ;;  %v1428_v51 = vadd.f32 %v409_v47, %v159_v41 }
 0x213   :  { %v368_v52 = vpop.f32.mrf.mxu0  ;;  %v411_v53 = vpop.f32.mrf.mxu1 }
 0x214   :  { %v432_v54 = vmul.f32 1.442695, %v890_v48  ;;  %v436_v55 = vmul.f32 1.442695, %v892_v49  ;;  %v891_v56 = vmul.f32 -1.702, %v1426_v50  ;;  %v369_v57 = vadd.f32 %v368_v52, %v147_v38 }
 0x215   :  { %v893_v58 = vmul.f32 -1.702, %v1428_v51  ;;  %v412_v59 = vadd.f32 %v411_v53, %v155_v39  ;;  %v370_v60 = vpop.f32.mrf.mxu0  ;;  %v413_v61 = vpop.f32.mrf.mxu1  ;;  %v856_v53 = vld [vmem:[#allocation4] ss:$0 sm:$0xff] }
 0x216   :  { %1071 = vpow2.f32 %v432_v54  ;;  %v434_v62 = vmul.f32 1.442695, %v891_v56  ;;  %v894_v63 = vmul.f32 -1.702, %v369_v57  ;;  %v371_v2 = vadd.f32 %v370_v60, %v151_v40 }
 0x217   :  { %1073 = vpow2.f32 %v436_v55  ;;  %v438_v3 = vmul.f32 1.442695, %v893_v58  ;;  %v896_v4 = vmul.f32 -1.702, %v412_v59  ;;  %v414_v5 = vadd.f32 %v413_v61, %v159_v41 }
 0x218   :  { %1075 = vpow2.f32 %v434_v62  ;;  %v440_v6 = vmul.f32 1.442695, %v894_v63  ;;  %v895_v7 = vmul.f32 -1.702, %v371_v2  ;;  %v105_v62 = vadd.f32 %v856_v53, %v1203_v1 }
 0x219   :  { %1077 = vpow2.f32 %v438_v3  ;;  %v444_v8 = vmul.f32 1.442695, %v896_v4  ;;  %v897_v9 = vmul.f32 -1.702, %v414_v5 }
 0x21a   :  { %1079 = vpow2.f32 %v440_v6  ;;  %v442_v10 = vmul.f32 1.442695, %v895_v7 }
 0x21b   :  { %1081 = vpow2.f32 %v444_v8  ;;  %v446_v11 = vmul.f32 1.442695, %v897_v9 }
 0x21c   :  { %1083 = vpow2.f32 %v442_v10 }
 0x21d   :  { %1085 = vpow2.f32 %v446_v11 }
 0x223   :  { %v1072_v12 = vpop.eup %1071 }
 0x224   :  { %v1074_v13 = vpop.eup %1073  ;;  %v448_v14 = vadd.f32 1.0, %v1072_v12 }
 0x225   :  { %v1076_v15 = vpop.eup %1075  ;;  %v450_v16 = vadd.f32 1.0, %v1074_v13 }
 0x226   :  { %v1078_v17 = vpop.eup %1077  ;;  %1087 = vrcp.f32 %v448_v14  ;;  %v449_v18 = vadd.f32 1.0, %v1076_v15 }
 0x227   :  { %v1080_v19 = vpop.eup %1079  ;;  %1089 = vrcp.f32 %v450_v16  ;;  %v451_v20 = vadd.f32 1.0, %v1078_v17 }
 0x228   :  { %v1082_v21 = vpop.eup %1081  ;;  %1091 = vrcp.f32 %v449_v18  ;;  %v452_v22 = vadd.f32 1.0, %v1080_v19 }
 0x229   :  { %v1084_v23 = vpop.eup %1083  ;;  %1093 = vrcp.f32 %v451_v20  ;;  %v454_v24 = vadd.f32 1.0, %v1082_v21 }
 0x22a   :  { %v1086_v25 = vpop.eup %1085  ;;  %1095 = vrcp.f32 %v452_v22  ;;  %v453_v26 = vadd.f32 1.0, %v1084_v23 }
 0x22b   :  { %1097 = vrcp.f32 %v454_v24  ;;  %v455_v27 = vadd.f32 1.0, %v1086_v25 }
 0x22c   :  { %1099 = vrcp.f32 %v453_v26 }
 0x22d   :  { %1101 = vrcp.f32 %v455_v27 }
 0x233   :  { %v1088_v28 = vpop.eup %1087 }
 0x234   :  { %v1090_v29 = vpop.eup %1089  ;;  %v472_v40 = vmul.f32 %v1088_v28, %v1420_v44  ;;  %v104_v44 = vadd.f32 %v856_v53, %v1198_v0 }
 0x235   :  { %v1092_v30 = vpop.eup %1091  ;;  %v474_v43 = vmul.f32 %v1090_v29, %v1422_v45 }
 0x236   :  { %v1094_v31 = vpop.eup %1093  ;;  %v473_v37 = vmul.f32 %v1092_v30, %v1426_v50 }
 0x237   :  { %v1096_v32 = vpop.eup %1095  ;;  %v475_v41 = vmul.f32 %v1094_v31, %v1428_v51 }
 0x238   :  { %v1098_v33 = vpop.eup %1097  ;;  %v476_v35 = vmul.f32 %v1096_v32, %v369_v57 }
 0x239   :  { %v1100_v34 = vpop.eup %1099  ;;  %v478_v38 = vmul.f32 %v1098_v33, %v412_v59 }
 0x23a   :  { %v1102_v36 = vpop.eup %1101  ;;  %v477_v39 = vmul.f32 %v1100_v34, %v371_v2  ;;  %v482_v47 = vpack.c.bf16 %v476_v35, %v472_v40 }
 0x23b   :  { %v479_v42 = vmul.f32 %v1102_v36, %v414_v5  ;;  %v484_v49 = vpack.c.bf16 %v478_v38, %v474_v43 }
 0x23c   :  { %v483_v46 = vpack.c.bf16 %v477_v39, %v473_v37 }
 0x23d   :  { %v485_v48 = vpack.c.bf16 %v479_v42, %v475_v41 }
 0x23e   :  { %774 = vmatprep.mubr.bf16.mxu0 %v483_v46 }
 0x23f   :  { %815 = vmatprep.mubr.bf16.mxu1 %v485_v48  ;;  %775 = vmatmul.mubr.bf16.vlgmr.msra.gmra.mxu0 %v482_v47 }
 0x240   :  { %816 = vmatmul.mubr.bf16.vlgmr.msra.gmra.mxu1 %v484_v49 }
 0x2ff   :  { %v953_v52 = vpop.f32.mrf.mxu0 }
 0x300   :  { %v975_v50 = vpop.f32.mrf.mxu1 }
 0x301   :  { %v954_v54 = vpop.f32.mrf.mxu0 }
 0x302   :  { %v955_v55 = vadd.f32 %v954_v54, %v953_v52  ;;  %v976_v56 = vpop.f32.mrf.mxu1 }
 0x303   :  { %v977_v51 = vadd.f32 %v976_v56, %v975_v50  ;;  %v956_v57 = vpop.f32.mrf.mxu0 }
 0x304   :  { %v978_v58 = vpop.f32.mrf.mxu1 }
 0x305   :  { %v818_v45 = vadd.f32 %v977_v51, %v955_v55  ;;  %v957_v59 = vpop.f32.mrf.mxu0 }
 0x306   :  { %v958_v60 = vadd.f32 %v957_v59, %v956_v57  ;;  %v979_v61 = vpop.f32.mrf.mxu1 }
 0x307   :  { %v824_v63 = vadd.f32 %v818_v45, %v104_v44  ;;  %v980_v2 = vadd.f32 %v979_v61, %v978_v58 }
 0x309   :  { %833 = vst [vmem:[#allocation7] sm:$0xff] %v824_v63  ;;  %v821_v3 = vadd.f32 %v980_v2, %v958_v60 }
 0x30b   :  { %v825_v4 = vadd.f32 %v821_v3, %v105_v62 }
 0x30d   :  { %834 = vst [vmem:[#allocation7 + $0x8] sm:$0xff] %v825_v4 }
 0x30e   :  { %1134 = shalt.err (!%p1131_p9)
}
 0x30f   :  { %s1150_s6 = smov 128   ;;  %s1151_s11 = smov 8  }
 0x310   :  { %846 = dma.vmem_to_hbm [thread:$0]  %s841_s5, 256, %s1448_s7, [#allocation6], %s1150_s6, %s1150_s6, %s1151_s11  }
 0x311   :  { %1145 = dma.done.wait [#allocation6], 256  }
 0x312   :  { %1146 = vsyncadd [#allocation6], 4294967040 }
 0x313   :  { %850 = vsyncpa [#allocation5], 1 }
 0x314   :  { %851 = vsyncpa [#allocation6], 1 }

</bundles_post_ra>
